<compile_context>
chip_gen: v7x
topology: tpu7x:2x2x1
jax: 0.10.0
libtpu: 0.0.40
codegen_flags: <defaults>
</compile_context>

<pallas_src>
import math

import jax
import jax.numpy as jnp
from jax import lax
from jax.experimental import pallas as pl
from jax.experimental.pallas import tpu as pltpu

NEG_SLOPE = 0.2
ACT_SCALE = math.sqrt(2.0)


def _mod_conv_block_kernel(x_ref, s_ref, d_ref, w_ref, noise_ref, ns_ref,
                           bias_ref, o_ref):
    """One batch element: modulated 3x3 conv + demod + noise + bias + act.

    x_ref     : (1, H+2, W+2, Cin)  spatially zero-padded input, NHWC
    s_ref     : (1, 1, Cin)         per-sample modulation scale  (affine(w)+1)
    d_ref     : (1, 1, Cout)        per-sample demodulation scale
    w_ref     : (9, Cin, Cout)      conv weight, tap-major (t = dy*3 + dx)
    noise_ref : (1, H, W, 1)        noise plane
    ns_ref    : (1, 1, 1)           AddNoise scale factor (per_channel=False)
    bias_ref  : (1, 1, Cout)        FusedLeakyReLU bias
    o_ref     : (1, H, W, Cout)
    """
    _, H, W, Cout = o_ref.shape
    Cin = x_ref.shape[3]

    s = s_ref[...]                                        # (1, 1, Cin)

    # 3x3 conv (padding=1) as 9 shifted matmuls over the channel axis.
    acc = jnp.zeros((H * W, Cout), dtype=jnp.float32)
    for t in range(9):                                    # unrolled taps
        dy, dx = divmod(t, 3)
        patch = x_ref[0, dy:dy + H, dx:dx + W, :] * s     # modulate input
        acc = acc + jnp.dot(patch.reshape(H * W, Cin), w_ref[t],
                            preferred_element_type=jnp.float32)

    y = acc.reshape(H, W, Cout)
    y = y * d_ref[...]                                    # demodulation
    y = y + ns_ref[...] * noise_ref[0]                    # noise injection
    y = y + bias_ref[...]                                 # activation bias
    # leaky_relu(y, 0.2) * sqrt(2), scale folded into the select
    y = y * jnp.where(y >= 0.0, ACT_SCALE, NEG_SLOPE * ACT_SCALE)
    o_ref[0] = y.astype(o_ref.dtype)


def style_generator_block(x, w_latent, noise, params):
    """StyleGeneratorBlock.forward (use_first_conv=False) via a fused Pallas kernel.

    x        : (B, Cin, H, W) float32, NCHW (same as PyTorch)
    w_latent : (B, L) latent vector
    noise    : (B, 1, H, W) noise (the PyTorch module samples it when None)
    params   : dict of module parameters (see __main__)
    returns  : (B, Cout, H, W) float32
    """
    B, Cin, H, W = x.shape
    conv_w = params["conv_w"]                                   # (Cout,Cin,3,3)
    Cout = conv_w.shape[0]

    # ---- tiny per-sample modulation / demodulation scalars (plain JAX) ----
    s = jnp.dot(w_latent, params["affine_w"].T,
                precision=lax.Precision.HIGHEST) + params["affine_b"] + 1.0
    w_mod = conv_w[None] * s[:, None, :, None, None]            # (B,Co,Ci,3,3)
    d = lax.rsqrt(jnp.sum(w_mod * w_mod, axis=(2, 3, 4)) + 1e-8)  # (B, Cout)

    # ---- layout prep for the kernel (NHWC, pre-padded halo) ----
    x_pad = jnp.pad(jnp.transpose(x, (0, 2, 3, 1)),
                    ((0, 0), (1, 1), (1, 1), (0, 0)))           # (B,H+2,W+2,Ci)
    w_taps = jnp.transpose(conv_w, (2, 3, 1, 0)).reshape(9, Cin, Cout)
    noise_nhwc = jnp.transpose(noise, (0, 2, 3, 1))             # (B,H,W,1)

    s3 = s.reshape(B, 1, Cin).astype(jnp.float32)
    d3 = d.reshape(B, 1, Cout).astype(jnp.float32)
    ns3 = jnp.asarray(params["noise_scale"], jnp.float32).reshape(1, 1, 1)
    bias3 = params["act_bias"].reshape(1, 1, Cout).astype(jnp.float32)

    out_nhwc = pl.pallas_call(
        _mod_conv_block_kernel,
        out_shape=jax.ShapeDtypeStruct((B, H, W, Cout), x.dtype),
        grid=(B,),
        in_specs=[
            pl.BlockSpec((1, H + 2, W + 2, Cin), lambda b: (b, 0, 0, 0)),
            pl.BlockSpec((1, 1, Cin), lambda b: (b, 0, 0)),
            pl.BlockSpec((1, 1, Cout), lambda b: (b, 0, 0)),
            pl.BlockSpec((9, Cin, Cout), lambda b: (0, 0, 0)),
            pl.BlockSpec((1, H, W, 1), lambda b: (b, 0, 0, 0)),
            pl.BlockSpec((1, 1, 1), lambda b: (0, 0, 0)),
            pl.BlockSpec((1, 1, Cout), lambda b: (0, 0, 0)),
        ],
        out_specs=pl.BlockSpec((1, H, W, Cout), lambda b: (b, 0, 0, 0)),
        compiler_params=pltpu.CompilerParams(
            dimension_semantics=("parallel",)),
    )(x_pad, s3, d3, w_taps, noise_nhwc, ns3, bias3)

    # TODO(synk): the use_first_conv=True path with upsample (conv_transpose +
    # upfirdn2d blur) is not implemented; the default StyleGeneratorBlock
    # configuration only requires this single conv -> noise -> act pass.
    return jnp.transpose(out_nhwc, (0, 3, 1, 2))


def _reference_forward(x, w_latent, noise, params):
    """Pure-JAX replica of the PyTorch fused_modconv path (for validation)."""
    B, Cin, H, W = x.shape
    conv_w = params["conv_w"]
    Cout = conv_w.shape[0]

    s = jnp.dot(w_latent, params["affine_w"].T,
                precision=lax.Precision.HIGHEST) + params["affine_b"] + 1.0
    w_mod = conv_w[None] * s[:, None, :, None, None]
    d = lax.rsqrt(jnp.sum(w_mod * w_mod, axis=(2, 3, 4)) + 1e-8)
    w_mod = w_mod * d[:, :, None, None, None]                   # (B,Co,Ci,3,3)

    x_g = x.reshape(1, B * Cin, H, W)
    w_g = w_mod.reshape(B * Cout, Cin, 3, 3)
    y = lax.conv_general_dilated(
        x_g, w_g, window_strides=(1, 1), padding=((1, 1), (1, 1)),
        dimension_numbers=("NCHW", "OIHW", "NCHW"),
        feature_group_count=B, precision=lax.Precision.HIGHEST)
    y = y.reshape(B, Cout, H, W)

    y = y + jnp.asarray(params["noise_scale"], jnp.float32) * noise
    y = y + params["act_bias"][None, :, None, None]
    return jnp.where(y >= 0.0, y, NEG_SLOPE * y) * ACT_SCALE


if __name__ == "__main__":
    key = jax.random.PRNGKey(0)
    B, C, H, W, L = 2, 4, 16, 16, 8   # batch, conv_size, spatial, latent_size
    kx, kw, kcw, kaw, kab, kb, kn = jax.random.split(key, 7)

    x = jax.random.normal(kx, (B, C, H, W), dtype=jnp.float32)
    w_latent = jax.random.normal(kw, (B, L), dtype=jnp.float32)
    noise = jax.random.normal(kn, (B, 1, H, W), dtype=jnp.float32)

    params = {
        # Conv2dModulated(conv_size, conv_size, latent_size, 3, 1, bias=False)
        "conv_w": 0.2 * jax.random.normal(kcw, (C, C, 3, 3), dtype=jnp.float32),
        "affine_w": 0.2 * jax.random.normal(kaw, (C, L), dtype=jnp.float32),
        "affine_b": 0.1 * jax.random.normal(kab, (C,), dtype=jnp.float32),
        # AddNoise(per_channel=False): single learnable scale (torch inits it
        # to 0; a non-zero value is used here so the noise path is exercised)
        "noise_scale": jnp.float32(0.3),
        # FusedLeakyReLU(channel) bias
        "act_bias": 0.1 * jax.random.normal(kb, (C,), dtype=jnp.float32),
    }

    out = style_generator_block(x, w_latent, noise, params)
    out = jax.block_until_ready(out)

    ref = _reference_forward(x, w_latent, noise, params)
    assert out.shape == (B, C, H, W) and out.dtype == x.dtype
    max_err = float(jnp.max(jnp.abs(out - ref)))
    assert max_err < 5e-3, f"max abs err {max_err}"
    print("KERNEL_OK")
</pallas_src>

<mosaic_0001>
module attributes {stable_mosaic.version = 11 : i64} {
  func.func @_mod_conv_block_kernel(%arg0: i32, %arg1: memref<1x18x18x4xf32, #tpu.memory_space<vmem>>, %arg2: memref<1x1x4xf32, #tpu.memory_space<vmem>>, %arg3: memref<1x1x4xf32, #tpu.memory_space<vmem>>, %arg4: memref<9x4x4xf32, #tpu.memory_space<vmem>>, %arg5: memref<1x16x16x1xf32, #tpu.memory_space<vmem>>, %arg6: memref<1x1x1xf32, #tpu.memory_space<vmem>>, %arg7: memref<1x1x4xf32, #tpu.memory_space<vmem>>, %arg8: memref<1x16x16x4xf32, #tpu.memory_space<vmem>>) attributes {dimension_semantics = [#tpu.dimension_semantics<parallel>], iteration_bounds = array<i64: 2>, scalar_prefetch = 0 : i64, scratch_operands = 0 : i64, tpu.core_type = #tpu.core_type<tc>, window_params = [{transform_indices = @transform_0, window_bounds = array<i64: 1, 18, 18, 4>}, {transform_indices = @transform_1, window_bounds = array<i64: 1, 1, 4>}, {transform_indices = @transform_2, window_bounds = array<i64: 1, 1, 4>}, {pipeline_mode = #tpu.pipeline_mode<synchronous>, transform_indices = @transform_3, window_bounds = array<i64: 9, 4, 4>}, {transform_indices = @transform_4, window_bounds = array<i64: 1, 16, 16, 1>}, {pipeline_mode = #tpu.pipeline_mode<synchronous>, transform_indices = @transform_5, window_bounds = array<i64: 1, 1, 1>}, {pipeline_mode = #tpu.pipeline_mode<synchronous>, transform_indices = @transform_6, window_bounds = array<i64: 1, 1, 4>}, {transform_indices = @transform_7, window_bounds = array<i64: 1, 16, 16, 4>}]} {
    %c0 = arith.constant 0 : index
    %c0_0 = arith.constant 0 : index
    %c0_1 = arith.constant 0 : index
    %0 = vector.load %arg2[%c0, %c0_0, %c0_1] : memref<1x1x4xf32, #tpu.memory_space<vmem>>, vector<1x1x4xf32>
    %cst = arith.constant 0.000000e+00 : f32
    %1 = vector.broadcast %cst : f32 to vector<256x4xf32>
    %c0_2 = arith.constant 0 : index
    %c0_3 = arith.constant 0 : index
    %c0_4 = arith.constant 0 : index
    %c0_5 = arith.constant 0 : index
    %2 = vector.load %arg1[%c0_2, %c0_3, %c0_4, %c0_5] : memref<1x18x18x4xf32, #tpu.memory_space<vmem>>, vector<1x16x16x4xf32>
    %3 = vector.shape_cast %2 : vector<1x16x16x4xf32> to vector<16x16x4xf32>
    %4 = vector.broadcast %0 : vector<1x1x4xf32> to vector<16x16x4xf32>
    %5 = arith.mulf %3, %4 : vector<16x16x4xf32>
    %6 = vector.shape_cast %5 : vector<16x16x4xf32> to vector<256x4xf32>
    %c0_6 = arith.constant 0 : index
    %c0_7 = arith.constant 0 : index
    %c0_8 = arith.constant 0 : index
    %7 = vector.load %arg4[%c0_6, %c0_7, %c0_8] : memref<9x4x4xf32, #tpu.memory_space<vmem>>, vector<1x4x4xf32>
    %8 = vector.shape_cast %7 : vector<1x4x4xf32> to vector<4x4xf32>
    %cst_9 = arith.constant dense<0.000000e+00> : vector<256x4xf32>
    %9 = tpu.matmul %6, %8, %cst_9 {dimension_numbers = #tpu.dot_dimension_numbers<[1], [0], [0], [1], [0, 0, 1, 1], [], []>} : vector<256x4xf32>, vector<4x4xf32>, vector<256x4xf32> -> vector<256x4xf32>
    %10 = arith.addf %1, %9 : vector<256x4xf32>
    %c0_10 = arith.constant 0 : index
    %c0_11 = arith.constant 0 : index
    %c1 = arith.constant 1 : index
    %c0_12 = arith.constant 0 : index
    %11 = vector.load %arg1[%c0_10, %c0_11, %c1, %c0_12] : memref<1x18x18x4xf32, #tpu.memory_space<vmem>>, vector<1x16x16x4xf32>
    %12 = vector.shape_cast %11 : vector<1x16x16x4xf32> to vector<16x16x4xf32>
    %13 = vector.broadcast %0 : vector<1x1x4xf32> to vector<16x16x4xf32>
    %14 = arith.mulf %12, %13 : vector<16x16x4xf32>
    %15 = vector.shape_cast %14 : vector<16x16x4xf32> to vector<256x4xf32>
    %c1_13 = arith.constant 1 : index
    %c0_14 = arith.constant 0 : index
    %c0_15 = arith.constant 0 : index
    %16 = vector.load %arg4[%c1_13, %c0_14, %c0_15] : memref<9x4x4xf32, #tpu.memory_space<vmem>>, vector<1x4x4xf32>
    %17 = vector.shape_cast %16 : vector<1x4x4xf32> to vector<4x4xf32>
    %cst_16 = arith.constant dense<0.000000e+00> : vector<256x4xf32>
    %18 = tpu.matmul %15, %17, %cst_16 {dimension_numbers = #tpu.dot_dimension_numbers<[1], [0], [0], [1], [0, 0, 1, 1], [], []>} : vector<256x4xf32>, vector<4x4xf32>, vector<256x4xf32> -> vector<256x4xf32>
    %19 = arith.addf %10, %18 : vector<256x4xf32>
    %c0_17 = arith.constant 0 : index
    %c0_18 = arith.constant 0 : index
    %c2 = arith.constant 2 : index
    %c0_19 = arith.constant 0 : index
    %20 = vector.load %arg1[%c0_17, %c0_18, %c2, %c0_19] : memref<1x18x18x4xf32, #tpu.memory_space<vmem>>, vector<1x16x16x4xf32>
    %21 = vector.shape_cast %20 : vector<1x16x16x4xf32> to vector<16x16x4xf32>
    %22 = vector.broadcast %0 : vector<1x1x4xf32> to vector<16x16x4xf32>
    %23 = arith.mulf %21, %22 : vector<16x16x4xf32>
    %24 = vector.shape_cast %23 : vector<16x16x4xf32> to vector<256x4xf32>
    %c2_20 = arith.constant 2 : index
    %c0_21 = arith.constant 0 : index
    %c0_22 = arith.constant 0 : index
    %25 = vector.load %arg4[%c2_20, %c0_21, %c0_22] : memref<9x4x4xf32, #tpu.memory_space<vmem>>, vector<1x4x4xf32>
    %26 = vector.shape_cast %25 : vector<1x4x4xf32> to vector<4x4xf32>
    %cst_23 = arith.constant dense<0.000000e+00> : vector<256x4xf32>
    %27 = tpu.matmul %24, %26, %cst_23 {dimension_numbers = #tpu.dot_dimension_numbers<[1], [0], [0], [1], [0, 0, 1, 1], [], []>} : vector<256x4xf32>, vector<4x4xf32>, vector<256x4xf32> -> vector<256x4xf32>
    %28 = arith.addf %19, %27 : vector<256x4xf32>
    %c0_24 = arith.constant 0 : index
    %c1_25 = arith.constant 1 : index
    %c0_26 = arith.constant 0 : index
    %c0_27 = arith.constant 0 : index
    %29 = vector.load %arg1[%c0_24, %c1_25, %c0_26, %c0_27] : memref<1x18x18x4xf32, #tpu.memory_space<vmem>>, vector<1x16x16x4xf32>
    %30 = vector.shape_cast %29 : vector<1x16x16x4xf32> to vector<16x16x4xf32>
    %31 = vector.broadcast %0 : vector<1x1x4xf32> to vector<16x16x4xf32>
    %32 = arith.mulf %30, %31 : vector<16x16x4xf32>
    %33 = vector.shape_cast %32 : vector<16x16x4xf32> to vector<256x4xf32>
    %c3 = arith.constant 3 : index
    %c0_28 = arith.constant 0 : index
    %c0_29 = arith.constant 0 : index
    %34 = vector.load %arg4[%c3, %c0_28, %c0_29] : memref<9x4x4xf32, #tpu.memory_space<vmem>>, vector<1x4x4xf32>
    %35 = vector.shape_cast %34 : vector<1x4x4xf32> to vector<4x4xf32>
    %cst_30 = arith.constant dense<0.000000e+00> : vector<256x4xf32>
    %36 = tpu.matmul %33, %35, %cst_30 {dimension_numbers = #tpu.dot_dimension_numbers<[1], [0], [0], [1], [0, 0, 1, 1], [], []>} : vector<256x4xf32>, vector<4x4xf32>, vector<256x4xf32> -> vector<256x4xf32>
    %37 = arith.addf %28, %36 : vector<256x4xf32>
    %c0_31 = arith.constant 0 : index
    %c1_32 = arith.constant 1 : index
    %c1_33 = arith.constant 1 : index
    %c0_34 = arith.constant 0 : index
    %38 = vector.load %arg1[%c0_31, %c1_32, %c1_33, %c0_34] : memref<1x18x18x4xf32, #tpu.memory_space<vmem>>, vector<1x16x16x4xf32>
    %39 = vector.shape_cast %38 : vector<1x16x16x4xf32> to vector<16x16x4xf32>
    %40 = vector.broadcast %0 : vector<1x1x4xf32> to vector<16x16x4xf32>
    %41 = arith.mulf %39, %40 : vector<16x16x4xf32>
    %42 = vector.shape_cast %41 : vector<16x16x4xf32> to vector<256x4xf32>
    %c4 = arith.constant 4 : index
    %c0_35 = arith.constant 0 : index
    %c0_36 = arith.constant 0 : index
    %43 = vector.load %arg4[%c4, %c0_35, %c0_36] : memref<9x4x4xf32, #tpu.memory_space<vmem>>, vector<1x4x4xf32>
    %44 = vector.shape_cast %43 : vector<1x4x4xf32> to vector<4x4xf32>
    %cst_37 = arith.constant dense<0.000000e+00> : vector<256x4xf32>
    %45 = tpu.matmul %42, %44, %cst_37 {dimension_numbers = #tpu.dot_dimension_numbers<[1], [0], [0], [1], [0, 0, 1, 1], [], []>} : vector<256x4xf32>, vector<4x4xf32>, vector<256x4xf32> -> vector<256x4xf32>
    %46 = arith.addf %37, %45 : vector<256x4xf32>
    %c0_38 = arith.constant 0 : index
    %c1_39 = arith.constant 1 : index
    %c2_40 = arith.constant 2 : index
    %c0_41 = arith.constant 0 : index
    %47 = vector.load %arg1[%c0_38, %c1_39, %c2_40, %c0_41] : memref<1x18x18x4xf32, #tpu.memory_space<vmem>>, vector<1x16x16x4xf32>
    %48 = vector.shape_cast %47 : vector<1x16x16x4xf32> to vector<16x16x4xf32>
    %49 = vector.broadcast %0 : vector<1x1x4xf32> to vector<16x16x4xf32>
    %50 = arith.mulf %48, %49 : vector<16x16x4xf32>
    %51 = vector.shape_cast %50 : vector<16x16x4xf32> to vector<256x4xf32>
    %c5 = arith.constant 5 : index
    %c0_42 = arith.constant 0 : index
    %c0_43 = arith.constant 0 : index
    %52 = vector.load %arg4[%c5, %c0_42, %c0_43] : memref<9x4x4xf32, #tpu.memory_space<vmem>>, vector<1x4x4xf32>
    %53 = vector.shape_cast %52 : vector<1x4x4xf32> to vector<4x4xf32>
    %cst_44 = arith.constant dense<0.000000e+00> : vector<256x4xf32>
    %54 = tpu.matmul %51, %53, %cst_44 {dimension_numbers = #tpu.dot_dimension_numbers<[1], [0], [0], [1], [0, 0, 1, 1], [], []>} : vector<256x4xf32>, vector<4x4xf32>, vector<256x4xf32> -> vector<256x4xf32>
    %55 = arith.addf %46, %54 : vector<256x4xf32>
    %c0_45 = arith.constant 0 : index
    %c2_46 = arith.constant 2 : index
    %c0_47 = arith.constant 0 : index
    %c0_48 = arith.constant 0 : index
    %56 = vector.load %arg1[%c0_45, %c2_46, %c0_47, %c0_48] : memref<1x18x18x4xf32, #tpu.memory_space<vmem>>, vector<1x16x16x4xf32>
    %57 = vector.shape_cast %56 : vector<1x16x16x4xf32> to vector<16x16x4xf32>
    %58 = vector.broadcast %0 : vector<1x1x4xf32> to vector<16x16x4xf32>
    %59 = arith.mulf %57, %58 : vector<16x16x4xf32>
    %60 = vector.shape_cast %59 : vector<16x16x4xf32> to vector<256x4xf32>
    %c6 = arith.constant 6 : index
    %c0_49 = arith.constant 0 : index
    %c0_50 = arith.constant 0 : index
    %61 = vector.load %arg4[%c6, %c0_49, %c0_50] : memref<9x4x4xf32, #tpu.memory_space<vmem>>, vector<1x4x4xf32>
    %62 = vector.shape_cast %61 : vector<1x4x4xf32> to vector<4x4xf32>
    %cst_51 = arith.constant dense<0.000000e+00> : vector<256x4xf32>
    %63 = tpu.matmul %60, %62, %cst_51 {dimension_numbers = #tpu.dot_dimension_numbers<[1], [0], [0], [1], [0, 0, 1, 1], [], []>} : vector<256x4xf32>, vector<4x4xf32>, vector<256x4xf32> -> vector<256x4xf32>
    %64 = arith.addf %55, %63 : vector<256x4xf32>
    %c0_52 = arith.constant 0 : index
    %c2_53 = arith.constant 2 : index
    %c1_54 = arith.constant 1 : index
    %c0_55 = arith.constant 0 : index
    %65 = vector.load %arg1[%c0_52, %c2_53, %c1_54, %c0_55] : memref<1x18x18x4xf32, #tpu.memory_space<vmem>>, vector<1x16x16x4xf32>
    %66 = vector.shape_cast %65 : vector<1x16x16x4xf32> to vector<16x16x4xf32>
    %67 = vector.broadcast %0 : vector<1x1x4xf32> to vector<16x16x4xf32>
    %68 = arith.mulf %66, %67 : vector<16x16x4xf32>
    %69 = vector.shape_cast %68 : vector<16x16x4xf32> to vector<256x4xf32>
    %c7 = arith.constant 7 : index
    %c0_56 = arith.constant 0 : index
    %c0_57 = arith.constant 0 : index
    %70 = vector.load %arg4[%c7, %c0_56, %c0_57] : memref<9x4x4xf32, #tpu.memory_space<vmem>>, vector<1x4x4xf32>
    %71 = vector.shape_cast %70 : vector<1x4x4xf32> to vector<4x4xf32>
    %cst_58 = arith.constant dense<0.000000e+00> : vector<256x4xf32>
    %72 = tpu.matmul %69, %71, %cst_58 {dimension_numbers = #tpu.dot_dimension_numbers<[1], [0], [0], [1], [0, 0, 1, 1], [], []>} : vector<256x4xf32>, vector<4x4xf32>, vector<256x4xf32> -> vector<256x4xf32>
    %73 = arith.addf %64, %72 : vector<256x4xf32>
    %c0_59 = arith.constant 0 : index
    %c2_60 = arith.constant 2 : index
    %c2_61 = arith.constant 2 : index
    %c0_62 = arith.constant 0 : index
    %74 = vector.load %arg1[%c0_59, %c2_60, %c2_61, %c0_62] : memref<1x18x18x4xf32, #tpu.memory_space<vmem>>, vector<1x16x16x4xf32>
    %75 = vector.shape_cast %74 : vector<1x16x16x4xf32> to vector<16x16x4xf32>
    %76 = vector.broadcast %0 : vector<1x1x4xf32> to vector<16x16x4xf32>
    %77 = arith.mulf %75, %76 : vector<16x16x4xf32>
    %78 = vector.shape_cast %77 : vector<16x16x4xf32> to vector<256x4xf32>
    %c8 = arith.constant 8 : index
    %c0_63 = arith.constant 0 : index
    %c0_64 = arith.constant 0 : index
    %79 = vector.load %arg4[%c8, %c0_63, %c0_64] : memref<9x4x4xf32, #tpu.memory_space<vmem>>, vector<1x4x4xf32>
    %80 = vector.shape_cast %79 : vector<1x4x4xf32> to vector<4x4xf32>
    %cst_65 = arith.constant dense<0.000000e+00> : vector<256x4xf32>
    %81 = tpu.matmul %78, %80, %cst_65 {dimension_numbers = #tpu.dot_dimension_numbers<[1], [0], [0], [1], [0, 0, 1, 1], [], []>} : vector<256x4xf32>, vector<4x4xf32>, vector<256x4xf32> -> vector<256x4xf32>
    %82 = arith.addf %73, %81 : vector<256x4xf32>
    %83 = vector.shape_cast %82 : vector<256x4xf32> to vector<16x16x4xf32>
    %c0_66 = arith.constant 0 : index
    %c0_67 = arith.constant 0 : index
    %c0_68 = arith.constant 0 : index
    %84 = vector.load %arg3[%c0_66, %c0_67, %c0_68] : memref<1x1x4xf32, #tpu.memory_space<vmem>>, vector<1x1x4xf32>
    %85 = vector.broadcast %84 : vector<1x1x4xf32> to vector<16x16x4xf32>
    %86 = arith.mulf %83, %85 : vector<16x16x4xf32>
    %c0_69 = arith.constant 0 : index
    %c0_70 = arith.constant 0 : index
    %c0_71 = arith.constant 0 : index
    %87 = vector.load %arg6[%c0_69, %c0_70, %c0_71] : memref<1x1x1xf32, #tpu.memory_space<vmem>>, vector<1x1x1xf32>
    %c0_72 = arith.constant 0 : index
    %c0_73 = arith.constant 0 : index
    %c0_74 = arith.constant 0 : index
    %c0_75 = arith.constant 0 : index
    %88 = vector.load %arg5[%c0_72, %c0_73, %c0_74, %c0_75] : memref<1x16x16x1xf32, #tpu.memory_space<vmem>>, vector<1x16x16x1xf32>
    %89 = vector.shape_cast %88 : vector<1x16x16x1xf32> to vector<16x16x1xf32>
    %90 = vector.broadcast %87 : vector<1x1x1xf32> to vector<16x16x1xf32>
    %91 = arith.mulf %90, %89 : vector<16x16x1xf32>
    %92 = vector.broadcast %91 : vector<16x16x1xf32> to vector<16x16x4xf32>
    %93 = arith.addf %86, %92 : vector<16x16x4xf32>
    %c0_76 = arith.constant 0 : index
    %c0_77 = arith.constant 0 : index
    %c0_78 = arith.constant 0 : index
    %94 = vector.load %arg7[%c0_76, %c0_77, %c0_78] : memref<1x1x4xf32, #tpu.memory_space<vmem>>, vector<1x1x4xf32>
    %95 = vector.broadcast %94 : vector<1x1x4xf32> to vector<16x16x4xf32>
    %96 = arith.addf %93, %95 : vector<16x16x4xf32>
    %cst_79 = arith.constant 0.000000e+00 : f32
    %97 = vector.broadcast %cst_79 : f32 to vector<16x16x4xf32>
    %98 = arith.cmpf oge, %96, %97 : vector<16x16x4xf32>
    %cst_80 = arith.constant 1.41421354 : f32
    %cst_81 = arith.constant 0.282842726 : f32
    %99 = vector.broadcast %cst_80 : f32 to vector<16x16x4xf32>
    %100 = vector.broadcast %cst_81 : f32 to vector<16x16x4xf32>
    %101 = arith.select %98, %99, %100 : vector<16x16x4xi1>, vector<16x16x4xf32>
    %102 = arith.mulf %96, %101 : vector<16x16x4xf32>
    %c0_82 = arith.constant 0 : index
    %c0_83 = arith.constant 0 : index
    %c0_84 = arith.constant 0 : index
    %c0_85 = arith.constant 0 : index
    %103 = vector.load %arg8[%c0_82, %c0_83, %c0_84, %c0_85] : memref<1x16x16x4xf32, #tpu.memory_space<vmem>>, vector<1x16x16x4xf32>
    %104 = vector.shape_cast %103 : vector<1x16x16x4xf32> to vector<16x16x4xf32>
    %105 = vector.shape_cast %102 : vector<16x16x4xf32> to vector<1x16x16x4xf32>
    tpu.vector_store %arg8[%c0_82, %c0_83, %c0_84, %c0_85], %105 {strides = array<i32>} : memref<1x16x16x4xf32, #tpu.memory_space<vmem>>, vector<1x16x16x4xf32>,
    return
  }
  func.func @transform_0(%arg0: i32) -> (i32, i32, i32, i32) {
    %c0_i32 = arith.constant 0 : i32
    %c0_i32_0 = arith.constant 0 : i32
    %c0_i32_1 = arith.constant 0 : i32
    %c0_i32_2 = arith.constant 0 : i32
    return %arg0, %c0_i32, %c0_i32_0, %c0_i32_1 : i32, i32, i32, i32
  }
  func.func @transform_1(%arg0: i32) -> (i32, i32, i32) {
    %c0_i32 = arith.constant 0 : i32
    %c0_i32_0 = arith.constant 0 : i32
    %c0_i32_1 = arith.constant 0 : i32
    return %arg0, %c0_i32, %c0_i32_0 : i32, i32, i32
  }
  func.func @transform_2(%arg0: i32) -> (i32, i32, i32) {
    %c0_i32 = arith.constant 0 : i32
    %c0_i32_0 = arith.constant 0 : i32
    %c0_i32_1 = arith.constant 0 : i32
    return %arg0, %c0_i32, %c0_i32_0 : i32, i32, i32
  }
  func.func @transform_3(%arg0: i32) -> (i32, i32, i32) {
    %c0_i32 = arith.constant 0 : i32
    %c0_i32_0 = arith.constant 0 : i32
    %c0_i32_1 = arith.constant 0 : i32
    %c0_i32_2 = arith.constant 0 : i32
    return %c0_i32, %c0_i32_0, %c0_i32_1 : i32, i32, i32
  }
  func.func @transform_4(%arg0: i32) -> (i32, i32, i32, i32) {
    %c0_i32 = arith.constant 0 : i32
    %c0_i32_0 = arith.constant 0 : i32
    %c0_i32_1 = arith.constant 0 : i32
    %c0_i32_2 = arith.constant 0 : i32
    return %arg0, %c0_i32, %c0_i32_0, %c0_i32_1 : i32, i32, i32, i32
  }
  func.func @transform_5(%arg0: i32) -> (i32, i32, i32) {
    %c0_i32 = arith.constant 0 : i32
    %c0_i32_0 = arith.constant 0 : i32
    %c0_i32_1 = arith.constant 0 : i32
    %c0_i32_2 = arith.constant 0 : i32
    return %c0_i32, %c0_i32_0, %c0_i32_1 : i32, i32, i32
  }
  func.func @transform_6(%arg0: i32) -> (i32, i32, i32) {
    %c0_i32 = arith.constant 0 : i32
    %c0_i32_0 = arith.constant 0 : i32
    %c0_i32_1 = arith.constant 0 : i32
    %c0_i32_2 = arith.constant 0 : i32
    return %c0_i32, %c0_i32_0, %c0_i32_1 : i32, i32, i32
  }
  func.func @transform_7(%arg0: i32) -> (i32, i32, i32, i32) {
    %c0_i32 = arith.constant 0 : i32
    %c0_i32_0 = arith.constant 0 : i32
    %c0_i32_1 = arith.constant 0 : i32
    %c0_i32_2 = arith.constant 0 : i32
    return %arg0, %c0_i32, %c0_i32_0, %c0_i32_1 : i32, i32, i32, i32
  }
}

</mosaic_0001>

<bundles_post_ra>
// kernel: tpu_custom_call.1
= control target key start
LH: loop header
LB: loop body
LE: loop exit
PB: predicated region body
PF: predicated region fallthrough
CT: control target
= control target key end

     0   :  { %s6215_s26 = smov 0   ;;  %s7688_s0 = inlined_call_operand.vmem [shape: f32[2,18,18,4], index: 0, kind: input, shape index: {}]   ;;  %s7689_s1 = inlined_call_operand.vmem [shape: f32[2,1,4], index: 1, kind: input, shape index: {}]   ;;  %s7690_s2 = inlined_call_operand.vmem [shape: f32[2,1,4], index: 2, kind: input, shape index: {}]   ;;  %s7691_s3 = inlined_call_operand.vmem [shape: f32[9,4,4], index: 3, kind: input, shape index: {}]   ;;  %s7692_s4 = inlined_call_operand.vmem [shape: f32[2,16,16,1], index: 4, kind: input, shape index: {}]   ;;  %s7693_s5 = inlined_call_operand.<no memory space> [shape: f32[1,1,1], index: 5, kind: input, shape index: {}]   ;;  %s7694_s6 = inlined_call_operand.vmem [shape: f32[1,1,4], index: 6, kind: input, shape index: {}]   ;;  %s7695_s7 = inlined_call_operand.vmem [shape: f32[2,16,16,4], index: 7, kind: output, shape index: {}]  }
   0x1   :  { %v12_v0 = vstv %s7693_s5 }
   0x2   :  { %13 = vst [vmem:[#allocation2] sm:$0x1] %v12_v0 }
   0x3 LB: > { %s4627_s27 = sadd.s32 4294967295, %s6168_s26   ;;  %p4631_p0 = scmp.ge.s32.totalorder %s6168_s26, 1  ;;  %s6168_s26 = sphi %s6215_s26, %s19_s26  }
   0x4   : > { %p265_p1 = scmp.lt.s32.totalorder %s6168_s26, 3 }
   0x6   : > { %p266_p2 = pnand %p4631_p0, %p265_p1 }
   0x8   : > { %269 = sbr.rel (%p266_p2) target bundleno = 535 (0x217), region = 48 }
   0xf   : > { %v4638_v1 = vld [vmem:[%s7691_s3 + $0x4] sm:$0xf]  ;;  %vm564_vm0 = vcmask 1043456   ;;  %v6229_v2 = vld [vmem:[%s7691_s3 + $0x10] sm:$0xf]  ;;  %p308_p3 = scmp.lt.s32.totalorder %s4627_s27, 1 }
  0x10   : > { %5439 = vmatprep.subr.msk.mxu1 %vm564_vm0, %v4638_v1  ;;  %5639 = vmatprep.subr.msk.mxu0 %vm564_vm0, %v6229_v2  ;;  %v400_v3 = vld [vmem:[%s7691_s3] sm:$0xf]  ;;  %v4903_v4 = vld [vmem:[%s7691_s3 + $0x14] sm:$0xf]  ;;  %vm467_vm1 = vcmask 31744  }
  0x11   : > { %5440 = vmatpush3.msk.msra.mxu1 %vm564_vm0, %v4638_v1  ;;  %5640 = vmatpush3.msk.msra.mxu0 %vm564_vm0, %v6229_v2  ;;  %s7811_s27 = smov (!%p308_p3, %s4627_s27), 1  ;;  %v6286_v19 = vld [vmem:[%s7691_s3 + $0x18] sm:$0xf]  ;;  %v6303_v23 = vld [vmem:[%s7691_s3 + $0x8] sm:$0xf] }
  0x12   : > { %5489 = vmatprep.subr.msk.mxu1 %vm564_vm0, %v400_v3  ;;  %5689 = vmatprep.subr.msk.mxu0 %vm564_vm0, %v4903_v4  ;;  %s6147_s12 = smul.u32 432, %s7811_s27  ;;  %s6252_s15 = scalar_lea.vmem %s7689_s1, %s7811_s27  ;;  %v6432_v56 = vld [vmem:[%s7691_s3 + $0x1c] sm:$0xf] }
  0x13   : > { %v6255_v5 = vld [vmem:[%s6252_s15] ss:$0 sm:$0xff]  ;;  %s5140_s30 = sshll.u32 %s7811_s27, 8 }
  0x14   : > { %s6260_s18 = scalar_lea.vmem %s7688_s0, %s6147_s12  ;;  %s6924_s10 = scalar_lea.vmem %s7692_s4, %s5140_s30 }
  0x15   : > { %v401_v6 = vld [vmem:[%s6260_s18 + $0x1] sm:$0xff]  ;;  %v4805_v7 = vld [vmem:[%s6260_s18 + $0x19] sm:$0xff]  ;;  %v402_v8 = vld [vmem:[%s6260_s18 + $0x9] sm:$0xff]  ;;  %s7481_s20 = scalar_lea.vmem %s7695_s7, %s5140_s30 }
  0x16   : > { %v433_v9 = vmul.f32 %v6255_v5, %v401_v6  ;;  %v1994_v10 = vmul.f32 %v4805_v7, %v6255_v5  ;;  %v434_v11 = vmul.f32 %v6255_v5, %v402_v8  ;;  %v4806_v12 = vld [vmem:[%s6260_s18 + $0x21] sm:$0xff]  ;;  %v4807_v13 = vld [vmem:[%s6260_s18 + $0x31] sm:$0xff]  ;;  %v4808_v14 = vld [vmem:[%s6260_s18 + $0x39] sm:$0xff] }
  0x17   : > { %v1995_v15 = vmul.f32 %v4806_v12, %v6255_v5  ;;  %v6273_v16 = vmul.f32 %v4807_v13, %v6255_v5  ;;  %v4809_v17 = vld [vmem:[%s6260_s18 + $0x49] sm:$0xff]  ;;  %v6281_v18 = vmul.f32 %v4808_v14, %v6255_v5  ;;  %v4810_v21 = vld [vmem:[%s6260_s18 + $0x51] sm:$0xff]  ;;  %v4811_v22 = vld [vmem:[%s6260_s18 + $0x61] sm:$0xff] }
  0x18   : > { %5441 = vmatprep.mubr.msk.f32.mxu1 %vm467_vm1, %v433_v9  ;;  %5641 = vmatprep.mubr.msk.f32.mxu0 %vm467_vm1, %v1994_v10  ;;  %v6291_v20 = vmul.f32 %v4809_v17, %v6255_v5  ;;  %v6309_v24 = vmul.f32 %v4810_v21, %v6255_v5  ;;  %v6316_v25 = vmul.f32 %v4811_v22, %v6255_v5  ;;  %v4812_v26 = vld [vmem:[%s6260_s18 + $0x69] sm:$0xff]  ;;  %v4813_v27 = vld [vmem:[%s6260_s18 + $0x79] sm:$0xff]  ;;  %v4814_v30 = vld [vmem:[%s6260_s18 + $0x81] sm:$0xff] }
  0x19   : > { %5442 = vmatmul.mubr.msk.f32.vlgmr.msra.gmra.mrb[0].mxu1 %vm467_vm1, %v434_v11  ;;  %5642 = vmatmul.mubr.msk.f32.vlgmr.msra.gmra.mrb[0].mxu0 %vm467_vm1, %v1995_v15  ;;  %v6327_v28 = vmul.f32 %v4812_v26, %v6255_v5  ;;  %v6334_v29 = vmul.f32 %v4813_v27, %v6255_v5  ;;  %v4815_v31 = vld [vmem:[%s6260_s18 + $0x91] sm:$0xff]  ;;  %v6343_v32 = vmul.f32 %v4814_v30, %v6255_v5  ;;  %v4816_v34 = vld [vmem:[%s6260_s18 + $0x99] sm:$0xff]  ;;  %v4817_v35 = vld [vmem:[%s6260_s18 + $0xa9] sm:$0xff] }
  0x1a   : > { %5490 = vmatpush3.msk.msra.mxu1 %vm564_vm0, %v400_v3  ;;  %5690 = vmatpush3.msk.msra.mxu0 %vm564_vm0, %v4903_v4  ;;  %v6350_v33 = vmul.f32 %v4815_v31, %v6255_v5  ;;  %v6359_v36 = vmul.f32 %v4816_v34, %v6255_v5  ;;  %v6366_v37 = vmul.f32 %v4817_v35, %v6255_v5  ;;  %v4818_v38 = vld [vmem:[%s6260_s18 + $0xb1] sm:$0xff]  ;;  %v4819_v39 = vld [vmem:[%s6260_s18 + $0xc1] sm:$0xff]  ;;  %v4820_v42 = vld [vmem:[%s6260_s18 + $0xc9] sm:$0xff] }
  0x1b   : > { %5444 = vmatprep.mubr.msk.f32.mxu1 %vm467_vm1, %v1994_v10  ;;  %5644 = vmatprep.mubr.msk.f32.mxu0 %vm467_vm1, %v6273_v16  ;;  %v6375_v40 = vmul.f32 %v4818_v38, %v6255_v5  ;;  %v6382_v41 = vmul.f32 %v4819_v39, %v6255_v5  ;;  %v4871_v43 = vld [vmem:[%s6260_s18 + $0x1a] sm:$0xff]  ;;  %v6391_v44 = vmul.f32 %v4820_v42, %v6255_v5  ;;  %v4872_v46 = vld [vmem:[%s6260_s18 + $0x22] sm:$0xff]  ;;  %v4873_v48 = vld [vmem:[%s6260_s18 + $0x32] sm:$0xff] }
  0x1c   : > { %5739 = vmatprep.subr.msk.mxu0 %vm564_vm0, %v6286_v19  ;;  %5539 = vmatprep.subr.msk.mxu1 %vm564_vm0, %v6303_v23  ;;  %v6398_v45 = vmul.f32 %v4871_v43, %v6255_v5  ;;  %v6402_v47 = vld [vmem:[%s6260_s18 + $0xd9] sm:$0xff]  ;;  %v6410_v49 = vmul.f32 %v4872_v46, %v6255_v5  ;;  %v6419_v51 = vld [vmem:[%s6260_s18 + $0xe1] sm:$0xff]  ;;  %v6423_v53 = vmul.f32 %v4873_v48, %v6255_v5  ;;  %v6426_v54 = vld [vmem:[%s6260_s18 + $0xf1] sm:$0xff] }
  0x1d   : > { %5445 = vmatmul.mubr.msk.f32.gmra.mrb[2].mxu1 %vm467_vm1, %v1995_v15  ;;  %5645 = vmatmul.mubr.msk.f32.gmra.mrb[2].mxu0 %vm467_vm1, %v6281_v18  ;;  %7734 = vst [vmem:[#allocation3_spill] sm:$0xff] %v6375_v40  ;;  %7735 = vst [vmem:[#allocation4_spill] sm:$0xff] %v6382_v41  ;;  %v451_v50 = vmul.f32 %v6255_v5, %v6402_v47  ;;  %v4874_v52 = vld [vmem:[%s6260_s18 + $0x3a] sm:$0xff]  ;;  %v4875_v55 = vld [vmem:[%s6260_s18 + $0x4a] sm:$0xff]  ;;  %v452_v57 = vmul.f32 %v6255_v5, %v6419_v51 }
  0x1e   : > { %5447 = vmatprep.mubr.msk.f32.mxu1 %vm467_vm1, %v6273_v16  ;;  %5647 = vmatprep.mubr.msk.f32.mxu0 %vm467_vm1, %v6291_v20  ;;  %7736 = vst [vmem:[#allocation5_spill] sm:$0xff] %v6391_v44  ;;  %7737 = vst [vmem:[#allocation6_spill] sm:$0xff] %v6402_v47  ;;  %v6441_v58 = vmul.f32 %v4874_v52, %v6255_v5  ;;  %v453_v59 = vmul.f32 %v6255_v5, %v6426_v54  ;;  %v6452_v61 = vld [vmem:[%s6260_s18 + $0xf9] sm:$0xff]  ;;  %v6458_v63 = vld [vmem:[%s6260_s18 + $0x109] sm:$0xff] }
  0x1f   : > { %7738 = vst [vmem:[#allocation7_spill] sm:$0xff] %v6419_v51  ;;  %7739 = vst [vmem:[#allocation8_spill] sm:$0xff] %v6426_v54  ;;  %v6449_v60 = vmul.f32 %v4875_v55, %v6255_v5  ;;  %v4876_v62 = vld [vmem:[%s6260_s18 + $0x52] sm:$0xff]  ;;  %v4877_v0 = vld [vmem:[%s6260_s18 + $0x62] sm:$0xff]  ;;  %v454_v1 = vmul.f32 %v6255_v5, %v6452_v61  ;;  %v455_v4 = vmul.f32 %v6255_v5, %v6458_v63 }
  0x20   : > { %7740 = vst [vmem:[#allocation9_spill] sm:$0xff] %v6452_v61  ;;  %7741 = vst [vmem:[#allocation10_spill] sm:$0xff] %v6458_v63  ;;  %v6469_v3 = vmul.f32 %v4876_v62, %v6255_v5  ;;  %v6477_v6 = vmul.f32 %v4877_v0, %v6255_v5  ;;  %v6480_v7 = vld [vmem:[%s6260_s18 + $0x111] sm:$0xff]  ;;  %v6484_v9 = vld [vmem:[%s6260_s18 + $0x121] sm:$0xff] }
  0x21   : > { %5448 = vmatmul.mubr.msk.f32.gmra.mrb[4].mxu1 %vm467_vm1, %v6281_v18  ;;  %5648 = vmatmul.mubr.msk.f32.gmra.mrb[4].mxu0 %vm467_vm1, %v6309_v24  ;;  %7742 = vst [vmem:[#allocation11_spill] sm:$0xff] %v6480_v7  ;;  %v4878_v8 = vld [vmem:[%s6260_s18 + $0x6a] sm:$0xff]  ;;  %7743 = vst [vmem:[#allocation12_spill] sm:$0xff] %v6484_v9  ;;  %v4879_v10 = vld [vmem:[%s6260_s18 + $0x7a] sm:$0xff]  ;;  %v456_v11 = vmul.f32 %v6255_v5, %v6480_v7  ;;  %v457_v13 = vmul.f32 %v6255_v5, %v6484_v9 }
  0x22   : > { %5450 = vmatprep.mubr.msk.f32.mxu1 %vm467_vm1, %v6291_v20  ;;  %5650 = vmatprep.mubr.msk.f32.mxu0 %vm467_vm1, %v6316_v25  ;;  %v6493_v12 = vmul.f32 %v4878_v8, %v6255_v5  ;;  %v6501_v14 = vmul.f32 %v4879_v10, %v6255_v5  ;;  %v6504_v15 = vld [vmem:[%s6260_s18 + $0x129] sm:$0xff]  ;;  %v4881_v21 = vld [vmem:[%s6260_s18 + $0x92] sm:$0xff]  ;;  %v6528_v31 = vld [vmem:[%s6260_s18 + $0x141] sm:$0xff] }
  0x23   : > { %7744 = vst [vmem:[#allocation13_spill] sm:$0xff] %v6504_v15  ;;  %v4880_v17 = vld [vmem:[%s6260_s18 + $0x82] sm:$0xff]  ;;  %v458_v22 = vmul.f32 %v6255_v5, %v6504_v15  ;;  %v6525_v30 = vmul.f32 %v4881_v21, %v6255_v5  ;;  %7746 = vst [vmem:[#allocation15_spill] sm:$0xff] %v6528_v31  ;;  %v4882_v34 = vld [vmem:[%s6260_s18 + $0x9a] sm:$0xff]  ;;  %v460_v39 = vmul.f32 %v6255_v5, %v6528_v31 }
  0x24   : > { %v6517_v26 = vmul.f32 %v4880_v17, %v6255_v5  ;;  %v6532_v35 = vld [vmem:[%s6260_s18 + $0x151] sm:$0xff]  ;;  %v6541_v42 = vmul.f32 %v4882_v34, %v6255_v5  ;;  %v6552_v48 = vld [vmem:[%s6260_s18 + $0x159] sm:$0xff]  ;;  %v6556_v52 = vld [vmem:[%s6260_s18 + $0x169] sm:$0xff] }
  0x25   : > { %5451 = vmatmul.mubr.msk.f32.gmra.mrb[6].mxu1 %vm467_vm1, %v6309_v24  ;;  %5651 = vmatmul.mubr.msk.f32.gmra.mrb[6].mxu0 %vm467_vm1, %v6327_v28  ;;  %7747 = vst [vmem:[#allocation16_spill] sm:$0xff] %v6532_v35  ;;  %v4883_v38 = vld [vmem:[%s6260_s18 + $0xaa] sm:$0xff]  ;;  %v461_v43 = vmul.f32 %v6255_v5, %v6532_v35  ;;  %7748 = vst [vmem:[#allocation17_spill] sm:$0xff] %v6552_v48  ;;  %v4885_v55 = vld [vmem:[%s6260_s18 + $0xc2] sm:$0xff]  ;;  %v463_v62 = vmul.f32 %v6255_v5, %v6556_v52 }
  0x26   : > { %5453 = vmatprep.mubr.msk.f32.mxu1 %vm467_vm1, %v6316_v25  ;;  %5653 = vmatprep.mubr.msk.f32.mxu0 %vm467_vm1, %v6334_v29  ;;  %v6549_v46 = vmul.f32 %v4883_v38, %v6255_v5  ;;  %7749 = vst [vmem:[#allocation18_spill] sm:$0xff] %v6556_v52  ;;  %v6573_v0 = vmul.f32 %v4885_v55, %v6255_v5  ;;  %v330_v8 = vld [vmem:[%s6260_s18] sm:$0xff]  ;;  %v6601_v34 = vld [vmem:[%s6260_s18 + $0x18] sm:$0xff]  ;;  %v336_v52 = vld [vmem:[%s6260_s18 + $0x48] sm:$0xff] }
  0x27   : > { %v4887_v10 = vld [vmem:[%s6260_s18 + $0xda] sm:$0xff]  ;;  %v368_v17 = vmul.f32 %v6255_v5, %v330_v8  ;;  %7751 = vst [vmem:[#allocation20_spill] sm:$0xff] %v6601_v34  ;;  %v6604_v38 = vld [vmem:[%s6260_s18 + $0xf2] sm:$0xff]  ;;  %v6627_v8 = vld [vmem:[%s6260_s18 + $0x10a] sm:$0xff] }
  0x28   : > { %v6594_v21 = vmul.f32 %v4887_v10, %v6255_v5  ;;  %v6618_v55 = vld [vmem:[%s6260_s18 + $0x20] sm:$0xff]  ;;  %v6632_v10 = vld [vmem:[%s7691_s3 + $0xc] sm:$0xf]  ;;  %v340_v15 = vld [vmem:[%s6260_s18 + $0x78] sm:$0xff] }
  0x29   : > { %5454 = vmatmul.mubr.msk.f32.gmra.mrb[8].mxu1 %vm467_vm1, %v6327_v28  ;;  %5654 = vmatmul.mubr.msk.f32.gmra.mrb[8].mxu0 %vm467_vm1, %v6343_v32  ;;  %7752 = vst [vmem:[#allocation21_spill] sm:$0xff] %v6618_v55  ;;  %v6680_v35 = vld [vmem:[%s6260_s18 + $0x13a] sm:$0xff]  ;;  %v6704_v9 = vld [vmem:[%s6260_s18 + $0x152] sm:$0xff]  ;;  %v6718_v7 = vmul.f32 %v6255_v5, %v340_v15  ;;  %v344_v51 = vld [vmem:[%s6260_s18 + $0xa8] sm:$0xff] }
  0x2a   : > { %5456 = vmatprep.mubr.msk.f32.mxu1 %vm467_vm1, %v6334_v29  ;;  %5656 = vmatprep.mubr.msk.f32.mxu0 %vm467_vm1, %v6350_v33  ;;  %7758 = vst [vmem:[#allocation27_spill] sm:$0xff] %v6704_v9  ;;  %v6724_v63 = vld [vmem:[%s6260_s18 + $0x15a] sm:$0xff]  ;;  %v342_v61 = vld [vmem:[%s6260_s18 + $0x90] sm:$0xff]  ;;  %v6764_v47 = vmul.f32 %v6255_v5, %v344_v51  ;;  %v347_v51 = vld [vmem:[%s6260_s18 + $0xc8] sm:$0xff] }
  0x2b   : > { %7760 = vst [vmem:[#allocation29_spill] sm:$0xff] %v6718_v7  ;;  %7761 = vst [vmem:[#allocation30_spill] sm:$0xff] %v6724_v63  ;;  %v2443_v15 = vmul.f32 %v6724_v63, %v6255_v5  ;;  %v6742_v54 = vmul.f32 %v6255_v5, %v342_v61  ;;  %v346_v63 = vld [vmem:[%s6260_s18 + $0xc0] sm:$0xff] }
  0x2c   : > { %7767 = vst [vmem:[#allocation36_spill] sm:$0xff] %v6764_v47 }
  0x2d   : > { %5457 = vmatmul.mubr.msk.f32.gmra.mrb[10].mxu1 %vm467_vm1, %v6343_v32  ;;  %5657 = vmatmul.mubr.msk.f32.gmra.mrb[10].mxu0 %vm467_vm1, %v6359_v36  ;;  %7764 = vst [vmem:[#allocation33_spill] sm:$0xff] %v6742_v54 }
  0x2e   : > { %5459 = vmatprep.mubr.msk.f32.mxu1 %vm467_vm1, %v6350_v33  ;;  %5659 = vmatprep.mubr.msk.f32.mxu0 %vm467_vm1, %v6366_v37 }
  0x31   : > { %5460 = vmatmul.mubr.msk.f32.gmra.mrb[12].mxu1 %vm467_vm1, %v6359_v36  ;;  %5660 = vmatmul.mubr.msk.f32.gmra.mrb[12].mxu0 %vm467_vm1, %v6375_v40 }
  0x32   : > { %5462 = vmatprep.mubr.msk.f32.mxu1 %vm467_vm1, %v6366_v37  ;;  %5662 = vmatprep.mubr.msk.f32.mxu0 %vm467_vm1, %v6382_v41 }
  0x35   : > { %5463 = vmatmul.mubr.msk.f32.gmra.mrb[14].mxu1 %vm467_vm1, %v6375_v40  ;;  %5663 = vmatmul.mubr.msk.f32.gmra.mrb[14].mxu0 %vm467_vm1, %v6391_v44 }
  0x36   : > { %5465 = vmatprep.mubr.msk.f32.mxu1 %vm467_vm1, %v6382_v41  ;;  %5691 = vmatprep.mubr.msk.f32.mxu0 %vm467_vm1, %v6398_v45  ;;  %v345_v41 = vld [vmem:[%s6260_s18 + $0xb0] sm:$0xff] }
  0x39   : > { %5466 = vmatmul.mubr.msk.f32.gmra.mrb[16].mxu1 %vm467_vm1, %v6391_v44  ;;  %5692 = vmatmul.mubr.msk.f32.vlgmr.msra.gmra.mrb[0].mxu0 %vm467_vm1, %v6410_v49  ;;  %v4901_v44 = vld [vmem:[%s6260_s18 + $0x182] sm:$0xff] }
  0x3a   : > { %5740 = vmatpush3.msk.msra.mxu0 %vm564_vm0, %v6286_v19  ;;  %5468 = vmatprep.mubr.msk.f32.mxu1 %vm467_vm1, %v451_v50  ;;  %v6508_v19 = vld [vmem:[%s6260_s18 + $0x139] sm:$0xff] }
  0x3b   : > { %5694 = vmatprep.mubr.msk.f32.mxu0 %vm467_vm1, %v6423_v53  ;;  %5789 = vmatprep.subr.msk.mxu0 %vm564_vm0, %v6432_v56  ;;  %7745 = vst [vmem:[#allocation14_spill] sm:$0xff] %v6508_v19  ;;  %v459_v27 = vmul.f32 %v6255_v5, %v6508_v19  ;;  %v4884_v50 = vld [vmem:[%s6260_s18 + $0xb2] sm:$0xff]  ;;  %v6700_v19 = vld [vmem:[%s6260_s18 + $0x142] sm:$0xff] }
  0x3d   : > { %5469 = vmatmul.mubr.msk.f32.gmra.mrb[18].mxu1 %vm467_vm1, %v452_v57  ;;  %5695 = vmatmul.mubr.msk.f32.gmra.mrb[2].mxu0 %vm467_vm1, %v6441_v58  ;;  %v462_v57 = vmul.f32 %v6255_v5, %v6552_v48  ;;  %v6655_v48 = vld [vmem:[%s6260_s18 + $0x122] sm:$0xff] }
  0x3e   : > { %5471 = vmatprep.mubr.msk.f32.mxu1 %vm467_vm1, %v453_v59  ;;  %5697 = vmatprep.mubr.msk.f32.mxu0 %vm467_vm1, %v6449_v60  ;;  %v6565_v59 = vmul.f32 %v4884_v50, %v6255_v5  ;;  %v370_v50 = vmul.f32 %v6255_v5, %v6601_v34  ;;  %v343_v34 = vld [vmem:[%s6260_s18 + $0x98] sm:$0xff] }
  0x41   : > { %5472 = vmatmul.mubr.msk.f32.gmra.mrb[20].mxu1 %vm467_vm1, %v454_v1  ;;  %5698 = vmatmul.mubr.msk.f32.gmra.mrb[4].mxu0 %vm467_vm1, %v6469_v3  ;;  %v6576_v1 = vld [vmem:[%s6260_s18 + $0x171] sm:$0xff] }
  0x42   : > { %5474 = vmatprep.mubr.msk.f32.mxu1 %vm467_vm1, %v455_v4  ;;  %5700 = vmatprep.mubr.msk.f32.mxu0 %vm467_vm1, %v6477_v6  ;;  %7750 = vst [vmem:[#allocation19_spill] sm:$0xff] %v6576_v1  ;;  %v4886_v4 = vld [vmem:[%s6260_s18 + $0xca] sm:$0xff] }
  0x45   : > { %5475 = vmatmul.mubr.msk.f32.gmra.mrb[22].mxu1 %vm467_vm1, %v456_v11  ;;  %5701 = vmatmul.mubr.msk.f32.gmra.mrb[6].mxu0 %vm467_vm1, %v6493_v12  ;;  %v464_v11 = vmul.f32 %v6255_v5, %v6576_v1  ;;  %v6650_v1 = vld [vmem:[%s6260_s18 + $0x112] sm:$0xff] }
  0x46   : > { %5477 = vmatprep.mubr.msk.f32.mxu1 %vm467_vm1, %v457_v13  ;;  %5703 = vmatprep.mubr.msk.f32.mxu0 %vm467_vm1, %v6501_v14  ;;  %v6587_v13 = vmul.f32 %v4886_v4, %v6255_v5  ;;  %v334_v4 = vld [vmem:[%s6260_s18 + $0x30] sm:$0xff] }
  0x49   : > { %5478 = vmatmul.mubr.msk.f32.gmra.mrb[24].mxu1 %vm467_vm1, %v458_v22  ;;  %5704 = vmatmul.mubr.msk.f32.gmra.mrb[8].mxu0 %vm467_vm1, %v6517_v26  ;;  %v331_v22 = vld [vmem:[%s6260_s18 + $0x8] sm:$0xff] }
  0x4a   : > { %5480 = vmatprep.mubr.msk.f32.mxu1 %vm467_vm1, %v459_v27  ;;  %5706 = vmatprep.mubr.msk.f32.mxu0 %vm467_vm1, %v6525_v30  ;;  %v6598_v27 = vld [vmem:[%s6260_s18 + $0xe2] sm:$0xff] }
  0x4d   : > { %5481 = vmatmul.mubr.msk.f32.gmra.mrb[26].mxu1 %vm467_vm1, %v460_v39  ;;  %5707 = vmatmul.mubr.msk.f32.gmra.mrb[10].mxu0 %vm467_vm1, %v6541_v42  ;;  %v369_v39 = vmul.f32 %v6255_v5, %v331_v22  ;;  %v6644_v22 = vmul.f32 %v6255_v5, %v334_v4  ;;  %v2438_v4 = vmul.f32 %v6655_v48, %v6255_v5 }
  0x4e   : > { %5483 = vmatprep.mubr.msk.f32.mxu1 %vm467_vm1, %v461_v43  ;;  %5709 = vmatprep.mubr.msk.f32.mxu0 %vm467_vm1, %v6549_v46  ;;  %v2433_v43 = vmul.f32 %v6598_v27, %v6255_v5 }
  0x4f   : > { %7753 = vst [vmem:[#allocation22_spill] sm:$0xff] %v6644_v22 }
  0x51   : > { %5484 = vmatmul.mubr.msk.f32.gmra.mrb[28].mxu1 %vm467_vm1, %v462_v57  ;;  %5710 = vmatmul.mubr.msk.f32.gmra.mrb[12].mxu0 %vm467_vm1, %v6565_v59  ;;  %v6621_v57 = vld [vmem:[%s6260_s18 + $0xfa] sm:$0xff] }
  0x52   : > { %5486 = vmatprep.mubr.msk.f32.mxu1 %vm467_vm1, %v463_v62  ;;  %5712 = vmatprep.mubr.msk.f32.mxu0 %vm467_vm1, %v6573_v0  ;;  %v2434_v62 = vmul.f32 %v6604_v38, %v6255_v5 }
  0x55   : > { %5487 = vmatmul.mubr.msk.f32.gmra.mrb[30].mxu1 %vm467_vm1, %v464_v11  ;;  %5713 = vmatmul.mubr.msk.f32.gmra.mrb[14].mxu0 %vm467_vm1, %v6587_v13  ;;  %v371_v11 = vmul.f32 %v6255_v5, %v6618_v55  ;;  %v6728_v55 = vld [vmem:[%s6260_s18 + $0x16a] sm:$0xff] }
  0x56   : > { %5491 = vmatprep.mubr.msk.f32.mxu1 %vm467_vm1, %v368_v17  ;;  %5715 = vmatprep.mubr.msk.f32.mxu0 %vm467_vm1, %v6594_v21  ;;  %v2435_v17 = vmul.f32 %v6621_v57, %v6255_v5  ;;  %7762 = vst [vmem:[#allocation31_spill] sm:$0xff] %v6728_v55 }
  0x59   : > { %5492 = vmatmul.mubr.msk.f32.vlgmr.msra.gmra.mrb[0].mxu1 %vm467_vm1, %v369_v39  ;;  %5716 = vmatmul.mubr.msk.f32.gmra.mrb[16].mxu0 %vm467_vm1, %v2433_v43  ;;  %v2436_v39 = vmul.f32 %v6627_v8, %v6255_v5  ;;  %v335_v43 = vld [vmem:[%s6260_s18 + $0x38] sm:$0xff] }
  0x5a   : > { %5540 = vmatpush3.msk.msra.mxu1 %vm564_vm0, %v6303_v23  ;;  %5494 = vmatprep.mubr.msk.f32.mxu1 %vm467_vm1, %v370_v50  ;;  %v6662_v23 = vmul.f32 %v6255_v5, %v335_v43  ;;  %v2437_v50 = vmul.f32 %v6650_v1, %v6255_v5  ;;  %v338_v43 = vld [vmem:[%s6260_s18 + $0x60] sm:$0xff] }
  0x5b   : > { %5718 = vmatprep.mubr.msk.f32.mxu0 %vm467_vm1, %v2434_v62  ;;  %5589 = vmatprep.subr.msk.mxu1 %vm564_vm0, %v6632_v10  ;;  %v6670_v62 = vmul.f32 %v6255_v5, %v336_v52  ;;  %v6694_v31 = vmul.f32 %v6255_v5, %v338_v43  ;;  %v2441_v43 = vmul.f32 %v6700_v19, %v6255_v5 }
  0x5c   : > { %7754 = vst [vmem:[#allocation23_spill] sm:$0xff] %v6662_v23 }
  0x5d   : > { %5495 = vmatmul.mubr.msk.f32.gmra.mrb[2].mxu1 %vm467_vm1, %v371_v11  ;;  %5719 = vmatmul.mubr.msk.f32.gmra.mrb[18].mxu0 %vm467_vm1, %v2435_v17  ;;  %7755 = vst [vmem:[#allocation24_spill] sm:$0xff] %v6670_v62  ;;  %v337_v11 = vld [vmem:[%s6260_s18 + $0x50] sm:$0xff]  ;;  %7757 = vst [vmem:[#allocation26_spill] sm:$0xff] %v6694_v31 }
  0x5e   : > { %5497 = vmatprep.mubr.msk.f32.mxu1 %vm467_vm1, %v6644_v22  ;;  %5721 = vmatprep.mubr.msk.f32.mxu0 %vm467_vm1, %v2436_v39  ;;  %v6676_v17 = vld [vmem:[%s6260_s18 + $0x12a] sm:$0xff]  ;;  %v6686_v39 = vmul.f32 %v6255_v5, %v337_v11 }
  0x5f   : > { %v2439_v52 = vmul.f32 %v6676_v17, %v6255_v5  ;;  %v339_v11 = vld [vmem:[%s6260_s18 + $0x68] sm:$0xff] }
  0x60   : > { %7756 = vst [vmem:[#allocation25_spill] sm:$0xff] %v6686_v39 }
  0x61   : > { %5498 = vmatmul.mubr.msk.f32.gmra.mrb[4].mxu1 %vm467_vm1, %v6662_v23  ;;  %5722 = vmatmul.mubr.msk.f32.gmra.mrb[20].mxu0 %vm467_vm1, %v2437_v50  ;;  %v2440_v50 = vmul.f32 %v6680_v35, %v6255_v5 }
  0x62   : > { %5500 = vmatprep.mubr.msk.f32.mxu1 %vm467_vm1, %v6670_v62  ;;  %5724 = vmatprep.mubr.msk.f32.mxu0 %vm467_vm1, %v2438_v4  ;;  %v6710_v4 = vmul.f32 %v6255_v5, %v339_v11  ;;  %v341_v11 = vld [vmem:[%s6260_s18 + $0x80] sm:$0xff] }
  0x64   : > { %7759 = vst [vmem:[#allocation28_spill] sm:$0xff] %v6710_v4 }
  0x65   : > { %5501 = vmatmul.mubr.msk.f32.gmra.mrb[6].mxu1 %vm467_vm1, %v6686_v39  ;;  %5725 = vmatmul.mubr.msk.f32.gmra.mrb[22].mxu0 %vm467_vm1, %v2439_v52  ;;  %v2442_v52 = vmul.f32 %v6704_v9, %v6255_v5 }
  0x66   : > { %5503 = vmatprep.mubr.msk.f32.mxu1 %vm467_vm1, %v6694_v31  ;;  %5727 = vmatprep.mubr.msk.f32.mxu0 %vm467_vm1, %v2440_v50  ;;  %v6734_v50 = vmul.f32 %v6255_v5, %v341_v11  ;;  %v6748_v11 = vld [vmem:[%s6260_s18 + $0x172] sm:$0xff] }
  0x67   : > { %7765 = vst [vmem:[#allocation34_spill] sm:$0xff] %v6748_v11  ;;  %v2445_v61 = vmul.f32 %v6748_v11, %v6255_v5  ;;  %v348_v11 = vld [vmem:[%s6260_s18 + $0xd8] sm:$0xff] }
  0x68   : > { %7763 = vst [vmem:[#allocation32_spill] sm:$0xff] %v6734_v50 }
  0x69   : > { %5504 = vmatmul.mubr.msk.f32.gmra.mrb[8].mxu1 %vm467_vm1, %v6710_v4  ;;  %5728 = vmatmul.mubr.msk.f32.gmra.mrb[24].mxu0 %vm467_vm1, %v2441_v43  ;;  %v2444_v43 = vmul.f32 %v6728_v55, %v6255_v5  ;;  %v2446_v55 = vmul.f32 %v4901_v44, %v6255_v5  ;;  %v6781_v44 = vmul.f32 %v6255_v5, %v346_v63 }
  0x6a   : > { %5506 = vmatprep.mubr.msk.f32.mxu1 %vm467_vm1, %v6718_v7  ;;  %5730 = vmatprep.mubr.msk.f32.mxu0 %vm467_vm1, %v2442_v52  ;;  %v6756_v52 = vmul.f32 %v6255_v5, %v343_v34  ;;  %v6774_v34 = vmul.f32 %v6255_v5, %v345_v41  ;;  %v6789_v41 = vmul.f32 %v6255_v5, %v347_v51  ;;  %v351_v51 = vld [vmem:[%s6260_s18 + $0xf8] sm:$0xff] }
  0x6b   : > { %7769 = vst [vmem:[#allocation38_spill] sm:$0xff] %v6781_v44  ;;  %v6796_v63 = vmul.f32 %v6255_v5, %v348_v11 }
  0x6c   : > { %7766 = vst [vmem:[#allocation35_spill] sm:$0xff] %v6756_v52  ;;  %7768 = vst [vmem:[#allocation37_spill] sm:$0xff] %v6774_v34 }
  0x6d   : > { %5507 = vmatmul.mubr.msk.f32.gmra.mrb[10].mxu1 %vm467_vm1, %v6734_v50  ;;  %5731 = vmatmul.mubr.msk.f32.gmra.mrb[26].mxu0 %vm467_vm1, %v2443_v15  ;;  %v4902_v15 = vld [vmem:[%s6260_s18 + $0x18a] sm:$0xff]  ;;  %7770 = vst [vmem:[#allocation39_spill] sm:$0xff] %v6789_v41  ;;  %7771 = vst [vmem:[#allocation40_spill] sm:$0xff] %v6796_v63 }
  0x6e   : > { %5509 = vmatprep.mubr.msk.f32.mxu1 %vm467_vm1, %v6742_v54  ;;  %5733 = vmatprep.mubr.msk.f32.mxu0 %vm467_vm1, %v2444_v43  ;;  %v2447_v43 = vmul.f32 %v4902_v15, %v6255_v5  ;;  %v6803_v15 = vld [vmem:[%s7691_s3 + $0x20] sm:$0xf] }
  0x71   : > { %5510 = vmatmul.mubr.msk.f32.gmra.mrb[12].mxu1 %vm467_vm1, %v6756_v52  ;;  %5734 = vmatmul.mubr.msk.f32.gmra.mrb[28].mxu0 %vm467_vm1, %v2445_v61  ;;  %v350_v61 = vld [vmem:[%s6260_s18 + $0xf0] sm:$0xff] }
  0x72   : > { %5512 = vmatprep.mubr.msk.f32.mxu1 %vm467_vm1, %v6764_v47  ;;  %5736 = vmatprep.mubr.msk.f32.mxu0 %vm467_vm1, %v2446_v55  ;;  %v349_v55 = vld [vmem:[%s6260_s18 + $0xe0] sm:$0xff]  ;;  %v6817_v11 = vmul.f32 %v6255_v5, %v350_v61  ;;  %v353_v61 = vld [vmem:[%s6260_s18 + $0x110] sm:$0xff] }
  0x75   : > { %5513 = vmatmul.mubr.msk.f32.gmra.mrb[14].mxu1 %vm467_vm1, %v6774_v34  ;;  %5737 = vmatmul.mubr.msk.f32.gmra.mrb[30].mxu0 %vm467_vm1, %v2447_v43  ;;  %v6810_v43 = vmul.f32 %v6255_v5, %v349_v55 }
  0x76   : > { %5515 = vmatprep.mubr.msk.f32.mxu1 %vm467_vm1, %v6781_v44  ;;  %5741 = vmatprep.mubr.msk.f32.mxu0 %vm467_vm1, %v6644_v22  ;;  %v352_v22 = vld [vmem:[%s6260_s18 + $0x108] sm:$0xff] }
  0x77   : > { %v6837_v55 = vmul.f32 %v6255_v5, %v352_v22 }
  0x79   : > { %5516 = vmatmul.mubr.msk.f32.gmra.mrb[16].mxu1 %vm467_vm1, %v6789_v41  ;;  %5742 = vmatmul.mubr.msk.f32.vlgmr.msra.gmra.mrb[0].mxu0 %vm467_vm1, %v6662_v23 }
  0x7a   : > { %5790 = vmatpush3.msk.msra.mxu0 %vm564_vm0, %v6432_v56  ;;  %5518 = vmatprep.mubr.msk.f32.mxu1 %vm467_vm1, %v6796_v63  ;;  %v6830_v56 = vmul.f32 %v6255_v5, %v351_v51  ;;  %v6846_v51 = vmul.f32 %v6255_v5, %v353_v61 }
  0x7b   : > { %5744 = vmatprep.mubr.msk.f32.mxu0 %vm467_vm1, %v6670_v62  ;;  %5839 = vmatprep.subr.msk.mxu0 %vm564_vm0, %v6803_v15  ;;  %v354_v62 = vld [vmem:[%s6260_s18 + $0x120] sm:$0xff] }
  0x7c   : > { %v6853_v22 = vmul.f32 %v6255_v5, %v354_v62 }
  0x7d   : > { %5519 = vmatmul.mubr.msk.f32.gmra.mrb[18].mxu1 %vm467_vm1, %v6810_v43  ;;  %5745 = vmatmul.mubr.msk.f32.gmra.mrb[2].mxu0 %vm467_vm1, %v6686_v39  ;;  %v356_v39 = vld [vmem:[%s6260_s18 + $0x138] sm:$0xff] }
  0x7e   : > { %5521 = vmatprep.mubr.msk.f32.mxu1 %vm467_vm1, %v6817_v11  ;;  %5747 = vmatprep.mubr.msk.f32.mxu0 %vm467_vm1, %v6694_v31  ;;  %v355_v31 = vld [vmem:[%s6260_s18 + $0x128] sm:$0xff]  ;;  %v6869_v62 = vmul.f32 %v6255_v5, %v356_v39 }
  0x7f   : > { %v6862_v61 = vmul.f32 %v6255_v5, %v355_v31 }
  0x81   : > { %5522 = vmatmul.mubr.msk.f32.gmra.mrb[20].mxu1 %vm467_vm1, %v6830_v56  ;;  %5748 = vmatmul.mubr.msk.f32.gmra.mrb[4].mxu0 %vm467_vm1, %v6710_v4  ;;  %v358_v4 = vld [vmem:[%s6260_s18 + $0x150] sm:$0xff] }
  0x82   : > { %5524 = vmatprep.mubr.msk.f32.mxu1 %vm467_vm1, %v6837_v55  ;;  %5750 = vmatprep.mubr.msk.f32.mxu0 %vm467_vm1, %v6718_v7  ;;  %v357_v7 = vld [vmem:[%s6260_s18 + $0x140] sm:$0xff]  ;;  %v6885_v39 = vmul.f32 %v6255_v5, %v358_v4 }
  0x83   : > { %v6878_v31 = vmul.f32 %v6255_v5, %v357_v7 }
  0x85   : > { %5525 = vmatmul.mubr.msk.f32.gmra.mrb[22].mxu1 %vm467_vm1, %v6846_v51  ;;  %5751 = vmatmul.mubr.msk.f32.gmra.mrb[6].mxu0 %vm467_vm1, %v6734_v50  ;;  %v360_v50 = vld [vmem:[%s6260_s18 + $0x168] sm:$0xff] }
  0x86   : > { %5527 = vmatprep.mubr.msk.f32.mxu1 %vm467_vm1, %v6853_v22  ;;  %5753 = vmatprep.mubr.msk.f32.mxu0 %vm467_vm1, %v6742_v54  ;;  %v359_v54 = vld [vmem:[%s6260_s18 + $0x158] sm:$0xff]  ;;  %v6901_v4 = vmul.f32 %v6255_v5, %v360_v50 }
  0x87   : > { %v6894_v7 = vmul.f32 %v6255_v5, %v359_v54 }
  0x89   : > { %5528 = vmatmul.mubr.msk.f32.gmra.mrb[24].mxu1 %vm467_vm1, %v6862_v61  ;;  %5754 = vmatmul.mubr.msk.f32.gmra.mrb[8].mxu0 %vm467_vm1, %v6756_v52  ;;  %v1117_v52 = vld [vmem:[%s6260_s18 + $0x2] sm:$0xff] }
  0x8a   : > { %5530 = vmatprep.mubr.msk.f32.mxu1 %vm467_vm1, %v6869_v62  ;;  %5756 = vmatprep.mubr.msk.f32.mxu0 %vm467_vm1, %v6764_v47  ;;  %v361_v47 = vld [vmem:[%s6260_s18 + $0x170] sm:$0xff]  ;;  %v1149_v50 = vmul.f32 %v6255_v5, %v1117_v52 }
  0x8b   : > { %v6910_v54 = vmul.f32 %v6255_v5, %v361_v47  ;;  %v6170_v47 = vmov 0  }
  0x8c   : > { %6159 = vset.pattern.permute.xlu1 %v6170_v47  ;;  %6158 = vset.pattern.permute.xlu0 %v6170_v47  ;;  %v4114_v47 = vld [vmem:[%s6924_s10 + $0x8] sm:$0xff] }
  0x8d   : > { %5531 = vmatmul.mubr.msk.f32.gmra.mrb[26].mxu1 %vm467_vm1, %v6878_v31  ;;  %5757 = vmatmul.mubr.msk.f32.gmra.mrb[10].mxu0 %vm467_vm1, %v6774_v34  ;;  %v4115_v34 = vld [vmem:[%s6924_s10 + $0x10] sm:$0xff] }
  0x8e   : > { %5533 = vmatprep.mubr.msk.f32.mxu1 %vm467_vm1, %v6885_v39  ;;  %5759 = vmatprep.mubr.msk.f32.mxu0 %vm467_vm1, %v6781_v44  ;;  %v1118_v44 = vld [vmem:[%s6260_s18 + $0xa] sm:$0xff] }
  0x8f   : > { %v1150_v40 = vmul.f32 %v6255_v5, %v1118_v44  ;;  %v4117_v44 = vld [vmem:[%s6924_s10 + $0x20] sm:$0xff] }
  0x91   : > { %5534 = vmatmul.mubr.msk.f32.gmra.mrb[28].mxu1 %vm467_vm1, %v6894_v7  ;;  %5760 = vmatmul.mubr.msk.f32.gmra.mrb[12].mxu0 %vm467_vm1, %v6789_v41  ;;  %v6926_v41 = vld [vmem:[#allocation2] ss:$0 sm:$0xff] }
  0x92   : > { %5536 = vmatprep.mubr.msk.f32.mxu1 %vm467_vm1, %v6901_v4  ;;  %5762 = vmatprep.mubr.msk.f32.mxu0 %vm467_vm1, %v6796_v63  ;;  %v4113_v63 = vld [vmem:[%s6924_s10] sm:$0xff]  ;;  %v4153_v52 = vmul.f32 %v6926_v41, %v4115_v34  ;;  %v4116_v34 = vld [vmem:[%s6924_s10 + $0x18] sm:$0xff]  ;;  %v4152_v9 = vmul.f32 %v6926_v41, %v4114_v47  ;;  %v4123_v47 = vld [vmem:[%s6924_s10 + $0x50] sm:$0xff] }
  0x93   : > { %v4151_v23 = vmul.f32 %v6926_v41, %v4113_v63  ;;  %v4154_v63 = vmul.f32 %v6926_v41, %v4116_v34 }
  0x94   : > { %4195 = vperm.xlu1 %6159, %v4153_v52  }
  0x95   : > { %5537 = vmatmul.mubr.msk.f32.gmra.mrb[30].mxu1 %vm467_vm1, %v6910_v54  ;;  %5763 = vmatmul.mubr.msk.f32.gmra.mrb[14].mxu0 %vm467_vm1, %v6810_v43 }
  0x96   : > { %5541 = vmatprep.mubr.msk.f32.mxu1 %vm467_vm1, %v1149_v50  ;;  %5765 = vmatprep.mubr.msk.f32.mxu0 %vm467_vm1, %v6817_v11  ;;  %v4155_v50 = vmul.f32 %v6926_v41, %v4117_v44  ;;  %v4967_v44 = vld [vmem:[%s6260_s18 + $0x198] sm:$0xff] }
  0x97   : > { %4185 = vperm.xlu0 %6158, %v4151_v23   ;;  %v4118_v23 = vld [vmem:[%s6924_s10 + $0x28] sm:$0xff] }
  0x98   : > { %4200 = vperm.xlu1 %6159, %v4154_v63   ;;  %v4161_v63 = vmul.f32 %v6926_v41, %v4123_v47 }
  0x99   : > { %5542 = vmatmul.mubr.msk.f32.vlgmr.msra.gmra.mrb[0].mxu1 %vm467_vm1, %v1150_v40  ;;  %5766 = vmatmul.mubr.msk.f32.gmra.mrb[16].mxu0 %vm467_vm1, %v6830_v56  ;;  %v4156_v40 = vmul.f32 %v6926_v41, %v4118_v23  ;;  %v4966_v23 = vld [vmem:[%s6260_s18 + $0x188] sm:$0xff] }
  0x9a   : > { %5590 = vmatpush3.msk.msra.mxu1 %vm564_vm0, %v6632_v10  ;;  %5544 = vmatprep.mubr.msk.f32.mxu1 %vm467_vm1, %v6398_v45  ;;  %v4119_v45 = vld [vmem:[%s6924_s10 + $0x30] sm:$0xff] }
  0x9b   : > { %5768 = vmatprep.mubr.msk.f32.mxu0 %vm467_vm1, %v6837_v55  ;;  %5889 = vmatprep.subr.msk.mxu1 %vm564_vm0, %v6229_v2  ;;  %v4120_v2 = vld [vmem:[%s6924_s10 + $0x38] sm:$0xff]  ;;  %v4157_v10 = vmul.f32 %v6926_v41, %v4119_v45  ;;  %v2869_v45 = vmul.f32 %v4967_v44, %v6255_v5 }
  0x9c   : > { %4190 = vperm.xlu0 %6158, %v4152_v9   ;;  %4210 = vperm.xlu1 %6159, %v4156_v40   ;;  %v4158_v9 = vmul.f32 %v6926_v41, %v4120_v2  ;;  %v4126_v40 = vld [vmem:[%s6924_s10 + $0x68] sm:$0xff] }
  0x9d   : > { %5545 = vmatmul.mubr.msk.f32.gmra.mrb[2].mxu1 %vm467_vm1, %v6410_v49  ;;  %5769 = vmatmul.mubr.msk.f32.gmra.mrb[18].mxu0 %vm467_vm1, %v6846_v51  ;;  %v4122_v49 = vld [vmem:[%s6924_s10 + $0x48] sm:$0xff] }
  0x9e   : > { %5547 = vmatprep.mubr.msk.f32.mxu1 %vm467_vm1, %v6423_v53  ;;  %5771 = vmatprep.mubr.msk.f32.mxu0 %vm467_vm1, %v6853_v22  ;;  %v4121_v53 = vld [vmem:[%s6924_s10 + $0x40] sm:$0xff]  ;;  %v4160_v52 = vmul.f32 %v6926_v41, %v4122_v49  ;;  %v4127_v49 = vld [vmem:[%s6924_s10 + $0x70] sm:$0xff] }
  0x9f   : > { %v4159_v34 = vmul.f32 %v6926_v41, %v4121_v53  ;;  %v4165_v53 = vmul.f32 %v6926_v41, %v4127_v49  ;;  %v4144_v49 = vld [vmem:[%s6924_s10 + $0xf8] sm:$0xff] }
  0xa0   : > { %4205 = vperm.xlu0 %6158, %v4155_v50   ;;  %4220 = vperm.xlu1 %6159, %v4158_v9   ;;  %v4125_v50 = vld [vmem:[%s6924_s10 + $0x60] sm:$0xff] }
  0xa1   : > { %5548 = vmatmul.mubr.msk.f32.gmra.mrb[4].mxu1 %vm467_vm1, %v6441_v58  ;;  %5772 = vmatmul.mubr.msk.f32.gmra.mrb[20].mxu0 %vm467_vm1, %v6862_v61  ;;  %v4965_v58 = vld [vmem:[%s6260_s18 + $0x180] sm:$0xff]  ;;  %v4163_v2 = vmul.f32 %v6926_v41, %v4125_v50 }
  0xa2   : > { %5550 = vmatprep.mubr.msk.f32.mxu1 %vm467_vm1, %v6449_v60  ;;  %5774 = vmatprep.mubr.msk.f32.mxu0 %vm467_vm1, %v6869_v62  ;;  %v4124_v60 = vld [vmem:[%s6924_s10 + $0x58] sm:$0xff]  ;;  %v4968_v9 = vld [vmem:[%s6260_s18 + $0x1a0] sm:$0xff] }
  0xa4   : > { %4215 = vperm.xlu0 %6158, %v4157_v10   ;;  %4230 = vperm.xlu1 %6159, %v4160_v52   ;;  %v4128_v10 = vld [vmem:[%s6924_s10 + $0x78] sm:$0xff]  ;;  %v4130_v52 = vld [vmem:[%s6924_s10 + $0x88] sm:$0xff] }
  0xa5   : > { %5551 = vmatmul.mubr.msk.f32.gmra.mrb[6].mxu1 %vm467_vm1, %v6469_v3  ;;  %5775 = vmatmul.mubr.msk.f32.gmra.mrb[22].mxu0 %vm467_vm1, %v6878_v31  ;;  %v4162_v3 = vmul.f32 %v6926_v41, %v4124_v60 }
  0xa6   : > { %5553 = vmatprep.mubr.msk.f32.mxu1 %vm467_vm1, %v6477_v6  ;;  %5777 = vmatprep.mubr.msk.f32.mxu0 %vm467_vm1, %v6885_v39  ;;  %v7005_v6 = vmul.f32 %v4965_v58, %v6255_v5  ;;  %v4168_v58 = vmul.f32 %v6926_v41, %v4130_v52  ;;  %v7777_v52 = vld [vmem:[#allocation6_spill] sm:$0xff] }
  0xa8   : > { %4225 = vperm.xlu0 %6158, %v4159_v34   ;;  %4240 = vperm.xlu1 %6159, %v4162_v3   ;;  %v4129_v34 = vld [vmem:[%s6924_s10 + $0x80] sm:$0xff] }
  0xa9   : > { %5554 = vmatmul.mubr.msk.f32.gmra.mrb[8].mxu1 %vm467_vm1, %v6493_v12  ;;  %5778 = vmatmul.mubr.msk.f32.gmra.mrb[24].mxu0 %vm467_vm1, %v6894_v7  ;;  %v4164_v12 = vmul.f32 %v6926_v41, %v4126_v40  ;;  %v4133_v3 = vld [vmem:[%s6924_s10 + $0xa0] sm:$0xff] }
  0xaa   : > { %5556 = vmatprep.mubr.msk.f32.mxu1 %vm467_vm1, %v6501_v14  ;;  %5780 = vmatprep.mubr.msk.f32.mxu0 %vm467_vm1, %v6901_v4  ;;  %v7018_v14 = vmul.f32 %v4966_v23, %v6255_v5 }
  0xac   : > { %4235 = vperm.xlu0 %6158, %v4161_v63   ;;  %4250 = vperm.xlu1 %6159, %v4164_v12  }
  0xad   : > { %5557 = vmatmul.mubr.msk.f32.gmra.mrb[10].mxu1 %vm467_vm1, %v6517_v26  ;;  %5781 = vmatmul.mubr.msk.f32.gmra.mrb[26].mxu0 %vm467_vm1, %v6910_v54  ;;  %v4166_v26 = vmul.f32 %v6926_v41, %v4128_v10 }
  0xae   : > { %5559 = vmatprep.mubr.msk.f32.mxu1 %vm467_vm1, %v6525_v30  ;;  %5783 = vmatprep.mubr.msk.f32.mxu0 %vm467_vm1, %v7005_v6  ;;  %v2870_v30 = vmul.f32 %v4968_v9, %v6255_v5  ;;  %v4132_v5 = vld [vmem:[%s6924_s10 + $0x98] sm:$0xff] }
  0xaf   : > { %v4170_v60 = vmul.f32 %v6926_v41, %v4132_v5  ;;  %v7778_v5 = vld [vmem:[#allocation5_spill] sm:$0xff] }
  0xb0   : > { %4245 = vperm.xlu0 %6158, %v4163_v2   ;;  %4260 = vperm.xlu1 %6159, %v4166_v26   ;;  %v4143_v26 = vld [vmem:[%s6924_s10 + $0xf0] sm:$0xff] }
  0xb1   : > { %5560 = vmatmul.mubr.msk.f32.gmra.mrb[12].mxu1 %vm467_vm1, %v6541_v42  ;;  %5784 = vmatmul.mubr.msk.f32.gmra.mrb[28].mxu0 %vm467_vm1, %v7018_v14  ;;  %v4167_v42 = vmul.f32 %v6926_v41, %v4129_v34 }
  0xb2   : > { %5562 = vmatprep.mubr.msk.f32.mxu1 %vm467_vm1, %v6549_v46  ;;  %5786 = vmatprep.mubr.msk.f32.mxu0 %vm467_vm1, %v2869_v45  ;;  %v4131_v46 = vld [vmem:[%s6924_s10 + $0x90] sm:$0xff] }
  0xb3   : > { %v4169_v47 = vmul.f32 %v6926_v41, %v4131_v46  ;;  %v7779_v46 = vld [vmem:[#allocation34_spill] sm:$0xff] }
  0xb4   : > { %4255 = vperm.xlu0 %6158, %v4165_v53   ;;  %4270 = vperm.xlu1 %6159, %v4168_v58   ;;  %v7776_v53 = vld [vmem:[#allocation31_spill] sm:$0xff]  ;;  %v4182_v58 = vmul.f32 %v6926_v41, %v4144_v49 }
  0xb5   : > { %5563 = vmatmul.mubr.msk.f32.gmra.mrb[14].mxu1 %vm467_vm1, %v6565_v59  ;;  %5787 = vmatmul.mubr.msk.f32.gmra.mrb[30].mxu0 %vm467_vm1, %v2870_v30  ;;  %v7058_v59 = vld [vmem:[%s6252_s15] ss:$0 sm:$0xff]  ;;  %v5031_v49 = vld [vmem:[%s6260_s18 + $0x181] sm:$0xff]  ;;  %s318_s15 = scalar_lea.vmem %s7690_s2, %s7811_s27 }
  0xb6   : > { %5565 = vmatprep.mubr.msk.f32.mxu1 %vm467_vm1, %v6573_v0  ;;  %5791 = vmatprep.mubr.msk.f32.mxu0 %vm467_vm1, %v6273_v16  ;;  %v1168_v0 = vmul.f32 %v7058_v59, %v6598_v27  ;;  %v4134_v16 = vld [vmem:[%s6924_s10 + $0xa8] sm:$0xff]  ;;  %v4171_v27 = vmul.f32 %v6926_v41, %v4133_v3  ;;  %v1179_v30 = vmul.f32 %v7058_v59, %v7776_v53 }
  0xb7   : > { %v3275_v34 = vmul.f32 %v7058_v59, %v7777_v52  ;;  %v7222_v52 = vmul.f32 %v7058_v59, %v5031_v49  ;;  %v4824_v49 = vld [vmem:[%s6260_s18 + $0xf9] sm:$0xff] }
  0xb8   : > { %4265 = vperm.xlu0 %6158, %v4167_v42   ;;  %4280 = vperm.xlu1 %6159, %v4170_v60   ;;  %v4181_v42 = vmul.f32 %v6926_v41, %v4143_v26  ;;  %v1180_v60 = vmul.f32 %v7058_v59, %v7779_v46  ;;  %v7801_v26 = vld [vmem:[#allocation32_spill] sm:$0xff] }
  0xb9   : > { %5566 = vmatmul.mubr.msk.f32.gmra.mrb[16].mxu1 %vm467_vm1, %v6587_v13  ;;  %5792 = vmatmul.mubr.msk.f32.vlgmr.msra.gmra.mrb[0].mxu0 %vm467_vm1, %v6281_v18  ;;  %v1169_v13 = vmul.f32 %v7058_v59, %v6604_v38  ;;  %v4172_v18 = vmul.f32 %v6926_v41, %v4134_v16  ;;  %v4136_v38 = vld [vmem:[%s6924_s10 + $0xb8] sm:$0xff]  ;;  %v7781_v16 = vld [vmem:[#allocation20_spill] sm:$0xff] }
  0xba   : > { %5840 = vmatpush3.msk.msra.mxu0 %vm564_vm0, %v6803_v15  ;;  %5568 = vmatprep.mubr.msk.f32.mxu1 %vm467_vm1, %v6594_v21  ;;  %v1170_v21 = vmul.f32 %v7058_v59, %v6621_v57  ;;  %v4135_v15 = vld [vmem:[%s6924_s10 + $0xb0] sm:$0xff]  ;;  %v4174_v63 = vmul.f32 %v6926_v41, %v4136_v38  ;;  %v4137_v57 = vld [vmem:[%s6924_s10 + $0xc0] sm:$0xff]  ;;  %v1572_v3 = vmul.f32 %v7058_v59, %v7781_v16 }
  0xbb   : > { %5794 = vmatprep.mubr.msk.f32.mxu0 %vm467_vm1, %v6291_v20  ;;  %v1171_v20 = vmul.f32 %v7058_v59, %v6627_v8  ;;  %v4173_v23 = vmul.f32 %v6926_v41, %v4135_v15  ;;  %v1173_v8 = vmul.f32 %v7058_v59, %v6655_v48  ;;  %v4175_v40 = vmul.f32 %v6926_v41, %v4137_v57  ;;  %v7785_v15 = vld [vmem:[#allocation10_spill] sm:$0xff]  ;;  %v7788_v57 = vld [vmem:[#allocation12_spill] sm:$0xff]  ;;  %v7806_v16 = vld [vmem:[#allocation37_spill] sm:$0xff] }
  0xbc   : > { %4275 = vperm.xlu0 %6158, %v4169_v47   ;;  %4290 = vperm.xlu1 %6159, %v4172_v18   ;;  %v1175_v48 = vmul.f32 %v7058_v59, %v6680_v35  ;;  %v7772_v35 = vld [vmem:[#allocation27_spill] sm:$0xff]  ;;  %v7783_v18 = vld [vmem:[#allocation21_spill] sm:$0xff]  ;;  %v7805_v46 = vld [vmem:[#allocation36_spill] sm:$0xff] }
  0xbd   : > { %5569 = vmatmul.mubr.msk.f32.gmra.mrb[18].mxu1 %vm467_vm1, %v1168_v0  ;;  %5795 = vmatmul.mubr.msk.f32.gmra.mrb[2].mxu0 %vm467_vm1, %v6309_v24  ;;  %v1172_v24 = vmul.f32 %v7058_v59, %v6650_v1  ;;  %v4139_v1 = vld [vmem:[%s6924_s10 + $0xd0] sm:$0xff]  ;;  %v1177_v2 = vmul.f32 %v7058_v59, %v7772_v35  ;;  %v7780_v47 = vld [vmem:[#allocation7_spill] sm:$0xff] }
  0xbe   : > { %5571 = vmatprep.mubr.msk.f32.mxu1 %vm467_vm1, %v1169_v13  ;;  %5797 = vmatprep.mubr.msk.f32.mxu0 %vm467_vm1, %v6316_v25  ;;  %v4138_v25 = vld [vmem:[%s6924_s10 + $0xc8] sm:$0xff]  ;;  %v4177_v12 = vmul.f32 %v6926_v41, %v4139_v1  ;;  %v3276_v0 = vmul.f32 %v7058_v59, %v7780_v47  ;;  %v7792_v1 = vld [vmem:[#allocation14_spill] sm:$0xff] }
  0xbf   : > { %v4176_v44 = vmul.f32 %v6926_v41, %v4138_v25  ;;  %v7782_v13 = vld [vmem:[#allocation8_spill] sm:$0xff]  ;;  %v7787_v25 = vld [vmem:[#allocation22_spill] sm:$0xff]  ;;  %v5034_v47 = vld [vmem:[%s6260_s18 + $0x1a1] sm:$0xff] }
  0xc0   : > { %4285 = vperm.xlu0 %6158, %v4171_v27   ;;  %4300 = vperm.xlu1 %6159, %v4174_v63   ;;  %v1573_v27 = vmul.f32 %v7058_v59, %v7783_v18  ;;  %v7786_v63 = vld [vmem:[#allocation11_spill] sm:$0xff] }
  0xc1   : > { %5572 = vmatmul.mubr.msk.f32.gmra.mrb[20].mxu1 %vm467_vm1, %v1170_v21  ;;  %5798 = vmatmul.mubr.msk.f32.gmra.mrb[4].mxu0 %vm467_vm1, %v6327_v28  ;;  %v1174_v28 = vmul.f32 %v7058_v59, %v6676_v17  ;;  %v4141_v17 = vld [vmem:[%s6924_s10 + $0xe0] sm:$0xff]  ;;  %v7784_v21 = vld [vmem:[#allocation9_spill] sm:$0xff] }
  0xc2   : > { %5574 = vmatprep.mubr.msk.f32.mxu1 %vm467_vm1, %v1171_v20  ;;  %5800 = vmatprep.mubr.msk.f32.mxu0 %vm467_vm1, %v6334_v29  ;;  %v4140_v29 = vld [vmem:[%s6924_s10 + $0xd8] sm:$0xff]  ;;  %v4179_v9 = vmul.f32 %v6926_v41, %v4141_v17  ;;  %v3278_v38 = vmul.f32 %v7058_v59, %v7784_v21  ;;  %v3279_v20 = vmul.f32 %v7058_v59, %v7785_v15  ;;  %v7796_v17 = vld [vmem:[#allocation16_spill] sm:$0xff]  ;;  %v7808_v21 = vld [vmem:[#allocation39_spill] sm:$0xff] }
  0xc3   : > { %v4178_v50 = vmul.f32 %v6926_v41, %v4140_v29  ;;  %v7791_v29 = vld [vmem:[#allocation24_spill] sm:$0xff]  ;;  %v3285_v35 = vmul.f32 %v7058_v59, %v7796_v17  ;;  %v5070_v18 = vld [vmem:[%s6260_s18 + $0x3a] sm:$0xff]  ;;  %v5085_v17 = vld [vmem:[%s6260_s18 + $0xf2] sm:$0xff] }
  0xc4   : > { %4295 = vperm.xlu0 %6158, %v4173_v23   ;;  %4310 = vperm.xlu1 %6159, %v4176_v44   ;;  %v3280_v23 = vmul.f32 %v7058_v59, %v7786_v63  ;;  %v7789_v44 = vld [vmem:[#allocation23_spill] sm:$0xff]  ;;  %v7809_v15 = vld [vmem:[#allocation40_spill] sm:$0xff]  ;;  %v5072_v63 = vld [vmem:[%s6260_s18 + $0x52] sm:$0xff] }
  0xc5   : > { %5575 = vmatmul.mubr.msk.f32.gmra.mrb[22].mxu1 %vm467_vm1, %v1172_v24  ;;  %5801 = vmatmul.mubr.msk.f32.gmra.mrb[6].mxu0 %vm467_vm1, %v6343_v32  ;;  %v1176_v32 = vmul.f32 %v7058_v59, %v6700_v19  ;;  %v7774_v19 = vld [vmem:[#allocation30_spill] sm:$0xff]  ;;  %v6161_v24 = vld [vmem:[%s7691_s3 + $0x10] sm:$0xf] }
  0xc6   : > { %5577 = vmatprep.mubr.msk.f32.mxu1 %vm467_vm1, %v1173_v8  ;;  %5803 = vmatprep.mubr.msk.f32.mxu0 %vm467_vm1, %v6350_v33  ;;  %v4142_v33 = vld [vmem:[%s6924_s10 + $0xe8] sm:$0xff]  ;;  %v1178_v10 = vmul.f32 %v7058_v59, %v7774_v19  ;;  %v3281_v8 = vmul.f32 %v7058_v59, %v7788_v57  ;;  %v7800_v19 = vld [vmem:[#allocation18_spill] sm:$0xff] }
  0xc7   : > { %v4180_v45 = vmul.f32 %v6926_v41, %v4142_v33  ;;  %v3277_v41 = vmul.f32 %v7058_v59, %v7782_v13  ;;  %v7795_v33 = vld [vmem:[#allocation26_spill] sm:$0xff]  ;;  %v5074_v57 = vld [vmem:[%s6260_s18 + $0x6a] sm:$0xff] }
  0xc8   : > { %4305 = vperm.xlu0 %6158, %v4175_v40   ;;  %4320 = vperm.xlu1 %6159, %v4178_v50   ;;  %v7790_v40 = vld [vmem:[#allocation13_spill] sm:$0xff]  ;;  %v7807_v13 = vld [vmem:[#allocation38_spill] sm:$0xff] }
  0xc9   : > { %5578 = vmatmul.mubr.msk.f32.gmra.mrb[24].mxu1 %vm467_vm1, %v1174_v28  ;;  %5804 = vmatmul.mubr.msk.f32.gmra.mrb[8].mxu0 %vm467_vm1, %v6359_v36  ;;  %v7773_v36 = vld [vmem:[#allocation3_spill] sm:$0xff]  ;;  %v3282_v28 = vmul.f32 %v7058_v59, %v7790_v40  ;;  %v7793_v50 = vld [vmem:[#allocation25_spill] sm:$0xff] }
  0xca   : > { %5580 = vmatprep.mubr.msk.f32.mxu1 %vm467_vm1, %v1175_v48  ;;  %5806 = vmatprep.mubr.msk.f32.mxu0 %vm467_vm1, %v6366_v37  ;;  %v7775_v37 = vld [vmem:[#allocation4_spill] sm:$0xff]  ;;  %v3283_v48 = vmul.f32 %v7058_v59, %v7792_v1  ;;  %v5077_v40 = vld [vmem:[%s6260_s18 + $0x92] sm:$0xff] }
  0xcb   : > { %v5080_v1 = vld [vmem:[%s6260_s18 + $0xb2] sm:$0xff] }
  0xcc   : > { %4315 = vperm.xlu0 %6158, %v4177_v12   ;;  %4330 = vperm.xlu1 %6159, %v4180_v45   ;;  %v7794_v12 = vld [vmem:[#allocation15_spill] sm:$0xff]  ;;  %v7798_v45 = vld [vmem:[#allocation17_spill] sm:$0xff] }
  0xcd   : > { %5581 = vmatmul.mubr.msk.f32.gmra.mrb[26].mxu1 %vm467_vm1, %v1176_v32  ;;  %5807 = vmatmul.mubr.msk.f32.gmra.mrb[10].mxu0 %vm467_vm1, %v7773_v36  ;;  %v3284_v32 = vmul.f32 %v7058_v59, %v7794_v12  ;;  %v7799_v36 = vld [vmem:[#allocation29_spill] sm:$0xff]  ;;  %v5083_v12 = vld [vmem:[%s6260_s18 + $0xda] sm:$0xff] }
  0xce   : > { %5583 = vmatprep.mubr.msk.f32.mxu1 %vm467_vm1, %v1177_v2  ;;  %5809 = vmatprep.mubr.msk.f32.mxu0 %vm467_vm1, %v7775_v37  ;;  %v7797_v2 = vld [vmem:[#allocation28_spill] sm:$0xff]  ;;  %v7802_v37 = vld [vmem:[#allocation19_spill] sm:$0xff] }
  0xcf   : > { %v3288_v53 = vmul.f32 %v7058_v59, %v7802_v37  ;;  %v5089_v37 = vld [vmem:[%s6260_s18 + $0x122] sm:$0xff] }
  0xd0   : > { %4325 = vperm.xlu0 %6158, %v4179_v9   ;;  %4340 = vperm.xlu1 %6159, %v4182_v58   ;;  %v3286_v9 = vmul.f32 %v7058_v59, %v7798_v45  ;;  %v5033_v58 = vld [vmem:[%s6260_s18 + $0x199] sm:$0xff] }
  0xd1   : > { %5584 = vmatmul.mubr.msk.f32.gmra.mrb[28].mxu1 %vm467_vm1, %v1178_v10  ;;  %5810 = vmatmul.mubr.msk.f32.gmra.mrb[12].mxu0 %vm467_vm1, %v7778_v5  ;;  %v3287_v10 = vmul.f32 %v7058_v59, %v7800_v19  ;;  %v5086_v45 = vld [vmem:[%s6260_s18 + $0xfa] sm:$0xff] }
  0xd2   : > { %5586 = vmatprep.mubr.msk.f32.mxu1 %vm467_vm1, %v1179_v30  ;;  %5812 = vmatprep.mubr.msk.f32.mxu0 %vm467_vm1, %v3275_v34  ;;  %v7803_v30 = vld [vmem:[#allocation33_spill] sm:$0xff]  ;;  %v5032_v34 = vld [vmem:[%s6260_s18 + $0x189] sm:$0xff] }
  0xd3   : > { %v7230_v5 = vmul.f32 %v7058_v59, %v5032_v34 }
  0xd4   : > { %4335 = vperm.xlu0 %6158, %v4181_v42   ;;  %v7804_v42 = vld [vmem:[#allocation35_spill] sm:$0xff] }
  0xd5   : > { %5587 = vmatmul.mubr.msk.f32.gmra.mrb[30].mxu1 %vm467_vm1, %v1180_v60  ;;  %5813 = vmatmul.mubr.msk.f32.gmra.mrb[14].mxu0 %vm467_vm1, %v3276_v0  ;;  %v3291_v60 = vmul.f32 %v7058_v59, %v5033_v58  ;;  %v5069_v0 = vld [vmem:[%s6260_s18 + $0x32] sm:$0xff]  ;;  %v3703_v58 = vmul.f32 %v7058_v59, %v5089_v37 }
  0xd6   : > { %5591 = vmatprep.mubr.msk.f32.mxu1 %vm467_vm1, %v1572_v3  ;;  %5815 = vmatprep.mubr.msk.f32.mxu0 %vm467_vm1, %v3277_v41  ;;  %v3292_v3 = vmul.f32 %v7058_v59, %v5034_v47  ;;  %v3683_v41 = vmul.f32 %v7058_v59, %v5069_v0  ;;  %v5091_v47 = vld [vmem:[%s6260_s18 + $0x13a] sm:$0xff] }
  0xd9   : > { %5592 = vmatmul.mubr.msk.f32.vlgmr.msra.gmra.mrb[0].mxu1 %vm467_vm1, %v1573_v27  ;;  %5816 = vmatmul.mubr.msk.f32.gmra.mrb[16].mxu0 %vm467_vm1, %v3278_v38  ;;  %v5071_v27 = vld [vmem:[%s6260_s18 + $0x4a] sm:$0xff]  ;;  %v3684_v38 = vmul.f32 %v7058_v59, %v5070_v18  ;;  %v5092_v18 = vld [vmem:[%s6260_s18 + $0x142] sm:$0xff] }
  0xda   : > { %5890 = vmatpush3.msk.msra.mxu1 %vm564_vm0, %v6161_v24  ;;  %5594 = vmatprep.mubr.msk.f32.mxu1 %vm467_vm1, %v7787_v25  ;;  %v3686_v24 = vmul.f32 %v7058_v59, %v5072_v63 }
  0xdb   : > { %5818 = vmatprep.mubr.msk.f32.mxu0 %vm467_vm1, %v3279_v20  ;;  %v3685_v20 = vmul.f32 %v7058_v59, %v5071_v27  ;;  %v4829_v27 = vld [vmem:[%s6260_s18 + $0x139] sm:$0xff] }
  0xdd   : > { %5595 = vmatmul.mubr.msk.f32.gmra.mrb[2].mxu1 %vm467_vm1, %v7789_v44  ;;  %5819 = vmatmul.mubr.msk.f32.gmra.mrb[18].mxu0 %vm467_vm1, %v3280_v23  ;;  %v5073_v23 = vld [vmem:[%s6260_s18 + $0x62] sm:$0xff] }
  0xde   : > { %5597 = vmatprep.mubr.msk.f32.mxu1 %vm467_vm1, %v7791_v29  ;;  %5821 = vmatprep.mubr.msk.f32.mxu0 %vm467_vm1, %v3281_v8  ;;  %v3687_v25 = vmul.f32 %v7058_v59, %v5073_v23  ;;  %v5075_v8 = vld [vmem:[%s6260_s18 + $0x7a] sm:$0xff]  ;;  %v5076_v44 = vld [vmem:[%s6260_s18 + $0x82] sm:$0xff]  ;;  %v5079_v29 = vld [vmem:[%s6260_s18 + $0xaa] sm:$0xff] }
  0xdf   : > { %v4830_v23 = vld [vmem:[%s6260_s18 + $0x141] sm:$0xff] }
  0xe1   : > { %5598 = vmatmul.mubr.msk.f32.gmra.mrb[4].mxu1 %vm467_vm1, %v7793_v50  ;;  %5822 = vmatmul.mubr.msk.f32.gmra.mrb[20].mxu0 %vm467_vm1, %v3282_v28  ;;  %v5078_v28 = vld [vmem:[%s6260_s18 + $0x9a] sm:$0xff]  ;;  %v5082_v50 = vld [vmem:[%s6260_s18 + $0xca] sm:$0xff] }
  0xe2   : > { %5600 = vmatprep.mubr.msk.f32.mxu1 %vm467_vm1, %v7795_v33  ;;  %5824 = vmatprep.mubr.msk.f32.mxu0 %vm467_vm1, %v3283_v48  ;;  %v5081_v48 = vld [vmem:[%s6260_s18 + $0xc2] sm:$0xff]  ;;  %v4821_v33 = vld [vmem:[%s6260_s18 + $0xd9] sm:$0xff] }
  0xe5   : > { %5601 = vmatmul.mubr.msk.f32.gmra.mrb[6].mxu1 %vm467_vm1, %v7797_v2  ;;  %5825 = vmatmul.mubr.msk.f32.gmra.mrb[22].mxu0 %vm467_vm1, %v3284_v32  ;;  %v5084_v32 = vld [vmem:[%s6260_s18 + $0xe2] sm:$0xff] }
  0xe6   : > { %5603 = vmatprep.mubr.msk.f32.mxu1 %vm467_vm1, %v7799_v36  ;;  %5827 = vmatprep.mubr.msk.f32.mxu0 %vm467_vm1, %v3285_v35  ;;  %v3699_v35 = vmul.f32 %v7058_v59, %v5085_v17  ;;  %v4822_v2 = vld [vmem:[%s6260_s18 + $0xe1] sm:$0xff]  ;;  %v3700_v36 = vmul.f32 %v7058_v59, %v5086_v45 }
  0xe9   : > { %5604 = vmatmul.mubr.msk.f32.gmra.mrb[8].mxu1 %vm467_vm1, %v7801_v26  ;;  %5828 = vmatmul.mubr.msk.f32.gmra.mrb[24].mxu0 %vm467_vm1, %v3286_v9  ;;  %v5087_v9 = vld [vmem:[%s6260_s18 + $0x10a] sm:$0xff] }
  0xea   : > { %5606 = vmatprep.mubr.msk.f32.mxu1 %vm467_vm1, %v7803_v30  ;;  %5830 = vmatprep.mubr.msk.f32.mxu0 %vm467_vm1, %v3287_v10  ;;  %v3701_v10 = vmul.f32 %v7058_v59, %v5087_v9  ;;  %v4825_v26 = vld [vmem:[%s6260_s18 + $0x109] sm:$0xff] }
  0xeb   : > { %v2014_v34 = vmul.f32 %v7058_v59, %v4825_v26 }
  0xed   : > { %5607 = vmatmul.mubr.msk.f32.gmra.mrb[10].mxu1 %vm467_vm1, %v7804_v42  ;;  %5831 = vmatmul.mubr.msk.f32.gmra.mrb[26].mxu0 %vm467_vm1, %v3288_v53  ;;  %v2013_v53 = vmul.f32 %v7058_v59, %v4824_v49  ;;  %v4826_v42 = vld [vmem:[%s6260_s18 + $0x111] sm:$0xff] }
  0xee   : > { %5609 = vmatprep.mubr.msk.f32.mxu1 %vm467_vm1, %v7805_v46  ;;  %5833 = vmatprep.mubr.msk.f32.mxu0 %vm467_vm1, %v7222_v52  ;;  %v5090_v46 = vld [vmem:[%s6260_s18 + $0x12a] sm:$0xff]  ;;  %v2015_v0 = vmul.f32 %v7058_v59, %v4826_v42 }
  0xf1   : > { %5610 = vmatmul.mubr.msk.f32.gmra.mrb[12].mxu1 %vm467_vm1, %v7806_v16  ;;  %5834 = vmatmul.mubr.msk.f32.gmra.mrb[28].mxu0 %vm467_vm1, %v7230_v5  ;;  %v3704_v16 = vmul.f32 %v7058_v59, %v5090_v46 }
  0xf2   : > { %5612 = vmatprep.mubr.msk.f32.mxu1 %vm467_vm1, %v7807_v13  ;;  %5836 = vmatprep.mubr.msk.f32.mxu0 %vm467_vm1, %v3291_v60  ;;  %v4827_v60 = vld [vmem:[%s6260_s18 + $0x121] sm:$0xff]  ;;  %v3705_v13 = vmul.f32 %v7058_v59, %v5091_v47 }
  0xf5   : > { %5613 = vmatmul.mubr.msk.f32.gmra.mrb[14].mxu1 %vm467_vm1, %v7808_v21  ;;  %5837 = vmatmul.mubr.msk.f32.gmra.mrb[30].mxu0 %vm467_vm1, %v3292_v3  ;;  %v2016_v3 = vmul.f32 %v7058_v59, %v4827_v60  ;;  %v5093_v21 = vld [vmem:[%s6260_s18 + $0x152] sm:$0xff] }
  0xf6   : > { %5615 = vmatprep.mubr.msk.f32.mxu1 %vm467_vm1, %v7809_v15  ;;  %5841 = vmatprep.mubr.msk.f32.mxu0 %vm467_vm1, %v3683_v41  ;;  %v4828_v41 = vld [vmem:[%s6260_s18 + $0x129] sm:$0xff]  ;;  %v3706_v15 = vmul.f32 %v7058_v59, %v5092_v18  ;;  %v3707_v63 = vmul.f32 %v7058_v59, %v5093_v21  ;;  %v7467_v21 = vld [vmem:[%s7694_s6] ss:$0 sm:$0xff] }
  0xf9   : > { %5616 = vmatmul.mubr.msk.f32.gmra.mrb[16].mxu1 %vm467_vm1, %v6810_v43  ;;  %5842 = vmatmul.mubr.msk.f32.vlgmr.msra.gmra.mrb[0].mxu0 %vm467_vm1, %v3684_v38  ;;  %v3688_v43 = vmul.f32 %v7058_v59, %v5074_v57  ;;  %v2017_v38 = vmul.f32 %v7058_v59, %v4828_v41  ;;  %v5095_v57 = vld [vmem:[%s6260_s18 + $0x16a] sm:$0xff] }
  0xfa   : > { %5618 = vmatprep.mubr.msk.f32.mxu1 %vm467_vm1, %v6817_v11  ;;  %5844 = vmatprep.mubr.msk.f32.mxu0 %vm467_vm1, %v3685_v20  ;;  %v3689_v11 = vmul.f32 %v7058_v59, %v5075_v8  ;;  %v2018_v20 = vmul.f32 %v7058_v59, %v4829_v27  ;;  %v2019_v8 = vmul.f32 %v7058_v59, %v4830_v23 }
  0xfd   : > { %5619 = vmatmul.mubr.msk.f32.gmra.mrb[18].mxu1 %vm467_vm1, %v6830_v56  ;;  %5845 = vmatmul.mubr.msk.f32.gmra.mrb[2].mxu0 %vm467_vm1, %v3686_v24  ;;  %v3690_v56 = vmul.f32 %v7058_v59, %v5076_v44  ;;  %v5094_v24 = vld [vmem:[%s6260_s18 + $0x15a] sm:$0xff]  ;;  %v3709_v44 = vmul.f32 %v7058_v59, %v5095_v57 }
  0xfe   : > { %5621 = vmatprep.mubr.msk.f32.mxu1 %vm467_vm1, %v6837_v55  ;;  %5847 = vmatprep.mubr.msk.f32.mxu0 %vm467_vm1, %v3687_v25  ;;  %v3691_v55 = vmul.f32 %v7058_v59, %v5077_v40  ;;  %v4831_v25 = vld [vmem:[%s6260_s18 + $0x151] sm:$0xff]  ;;  %v4832_v40 = vld [vmem:[%s6260_s18 + $0x159] sm:$0xff] }
 0x101   : > { %5622 = vmatmul.mubr.msk.f32.gmra.mrb[20].mxu1 %vm467_vm1, %v6846_v51  ;;  %5848 = vmatmul.mubr.msk.f32.gmra.mrb[4].mxu0 %vm467_vm1, %v3688_v43  ;;  %v3692_v51 = vmul.f32 %v7058_v59, %v5078_v28  ;;  %v3708_v43 = vmul.f32 %v7058_v59, %v5094_v24  ;;  %v5097_v28 = vld [vmem:[%s6260_s18 + $0x182] sm:$0xff] }
 0x102   : > { %5624 = vmatprep.mubr.msk.f32.mxu1 %vm467_vm1, %v6853_v22  ;;  %5850 = vmatprep.mubr.msk.f32.mxu0 %vm467_vm1, %v3689_v11  ;;  %v3693_v22 = vmul.f32 %v7058_v59, %v5079_v29  ;;  %v2020_v11 = vmul.f32 %v7058_v59, %v4831_v25  ;;  %v2021_v29 = vmul.f32 %v7058_v59, %v4832_v40 }
 0x105   : > { %5625 = vmatmul.mubr.msk.f32.gmra.mrb[22].mxu1 %vm467_vm1, %v6862_v61  ;;  %5851 = vmatmul.mubr.msk.f32.gmra.mrb[6].mxu0 %vm467_vm1, %v3690_v56  ;;  %v3694_v61 = vmul.f32 %v7058_v59, %v5080_v1  ;;  %v5096_v56 = vld [vmem:[%s6260_s18 + $0x172] sm:$0xff]  ;;  %v3711_v1 = vmul.f32 %v7058_v59, %v5097_v28 }
 0x106   : > { %5627 = vmatprep.mubr.msk.f32.mxu1 %vm467_vm1, %v6869_v62  ;;  %5853 = vmatprep.mubr.msk.f32.mxu0 %vm467_vm1, %v3691_v55  ;;  %v3695_v62 = vmul.f32 %v7058_v59, %v5081_v48  ;;  %v4833_v55 = vld [vmem:[%s6260_s18 + $0x169] sm:$0xff]  ;;  %v4834_v48 = vld [vmem:[%s6260_s18 + $0x171] sm:$0xff] }
 0x109   : > { %5628 = vmatmul.mubr.msk.f32.gmra.mrb[24].mxu1 %vm467_vm1, %v6878_v31  ;;  %5854 = vmatmul.mubr.msk.f32.gmra.mrb[8].mxu0 %vm467_vm1, %v3692_v51  ;;  %v3696_v31 = vmul.f32 %v7058_v59, %v5082_v50  ;;  %v3710_v51 = vmul.f32 %v7058_v59, %v5096_v56  ;;  %v2023_v50 = vmul.f32 %v7058_v59, %v4834_v48 }
 0x10a   : > { %5630 = vmatprep.mubr.msk.f32.mxu1 %vm467_vm1, %v6885_v39  ;;  %5856 = vmatprep.mubr.msk.f32.mxu0 %vm467_vm1, %v3693_v22  ;;  %v3697_v39 = vmul.f32 %v7058_v59, %v5083_v12  ;;  %v2022_v22 = vmul.f32 %v7058_v59, %v4833_v55 }
 0x10d   : > { %5631 = vmatmul.mubr.msk.f32.gmra.mrb[26].mxu1 %vm467_vm1, %v6894_v7  ;;  %5857 = vmatmul.mubr.msk.f32.gmra.mrb[10].mxu0 %vm467_vm1, %v3694_v61  ;;  %v3698_v7 = vmul.f32 %v7058_v59, %v5084_v32  ;;  %v5098_v61 = vld [vmem:[%s6260_s18 + $0x18a] sm:$0xff] }
 0x10e   : > { %5633 = vmatprep.mubr.msk.f32.mxu1 %vm467_vm1, %v6901_v4  ;;  %5859 = vmatprep.mubr.msk.f32.mxu0 %vm467_vm1, %v3695_v62  ;;  %v2010_v4 = vmul.f32 %v7058_v59, %v4821_v33  ;;  %v5099_v62 = vld [vmem:[%s6260_s18 + $0x19a] sm:$0xff]  ;;  %v3712_v12 = vmul.f32 %v7058_v59, %v5098_v61 }
 0x111   : > { %5634 = vmatmul.mubr.msk.f32.gmra.mrb[28].mxu1 %vm467_vm1, %v6910_v54  ;;  %5860 = vmatmul.mubr.msk.f32.gmra.mrb[12].mxu0 %vm467_vm1, %v3696_v31  ;;  %v4823_v54 = vld [vmem:[%s6260_s18 + $0xf1] sm:$0xff]  ;;  %v3713_v31 = vmul.f32 %v7058_v59, %v5099_v62 }
 0x112   : > { %5636 = vmatprep.mubr.msk.f32.mxu1 %vm467_vm1, %v7005_v6  ;;  %5862 = vmatprep.mubr.msk.f32.mxu0 %vm467_vm1, %v3697_v39  ;;  %v2011_v6 = vmul.f32 %v7058_v59, %v4822_v2  ;;  %v2012_v19 = vmul.f32 %v7058_v59, %v4823_v54  ;;  %v5100_v39 = vld [vmem:[%s6260_s18 + $0x1a2] sm:$0xff] }
 0x113   : > { %v3714_v32 = vmul.f32 %v7058_v59, %v5100_v39  ;;  %v4196_v33 = vpop.permute.xlu1 %4195 }
 0x115   : > { %5637 = vmatmul.mubr.msk.f32.gmra.mrb[30].mxu1 %vm467_vm1, %v7018_v14  ;;  %5863 = vmatmul.mubr.msk.f32.gmra.mrb[14].mxu0 %vm467_vm1, %v3698_v7  ;;  %v5088_v14 = vld [vmem:[%s6260_s18 + $0x112] sm:$0xff] }
 0x116   : > { %5665 = vmatprep.mubr.msk.f32.mxu1 %vm467_vm1, %v2010_v4  ;;  %5865 = vmatprep.mubr.msk.f32.mxu0 %vm467_vm1, %v3699_v35  ;;  %v3702_v30 = vmul.f32 %v7058_v59, %v5088_v14  ;;  %v4186_v7 = vpop.permute.xlu0 %4185 }
 0x117   : > { %v4201_v45 = vpop.permute.xlu1 %4200 }
 0x119   : > { %5666 = vmatmul.mubr.msk.f32.vlgmr.msra.gmra.mrb[16].mxu1 %vm467_vm1, %v2011_v6  ;;  %5866 = vmatmul.mubr.msk.f32.gmra.mrb[16].mxu0 %vm467_vm1, %v3700_v36 }
 0x11a   : > { %5668 = vmatprep.mubr.msk.f32.mxu1 %vm467_vm1, %v2012_v19  ;;  %5868 = vmatprep.mubr.msk.f32.mxu0 %vm467_vm1, %v3701_v10 }
 0x11b   : > { %v4191_v54 = vpop.permute.xlu0 %4190  ;;  %v4211_v6 = vpop.permute.xlu1 %4210 }
 0x11d   : > { %5669 = vmatmul.mubr.msk.f32.gmra.mrb[18].mxu1 %vm467_vm1, %v2013_v53  ;;  %5869 = vmatmul.mubr.msk.f32.gmra.mrb[18].mxu0 %vm467_vm1, %v3702_v30 }
 0x11e   : > { %5671 = vmatprep.mubr.msk.f32.mxu1 %vm467_vm1, %v2014_v34  ;;  %5871 = vmatprep.mubr.msk.f32.mxu0 %vm467_vm1, %v3703_v58 }
 0x11f   : > { %v7423_v36 = vpop.permute.xlu0 %4205  ;;  %v7431_v49 = vpop.permute.xlu1 %4220 }
 0x121   : > { %5672 = vmatmul.mubr.msk.f32.gmra.mrb[20].mxu1 %vm467_vm1, %v2015_v0  ;;  %5872 = vmatmul.mubr.msk.f32.gmra.mrb[20].mxu0 %vm467_vm1, %v3704_v16  ;;  %v7459_v16 = vld [vmem:[%s318_s15] ss:$0 sm:$0xff] }
 0x122   : > { %5674 = vmatprep.mubr.msk.f32.mxu1 %vm467_vm1, %v2016_v3  ;;  %5874 = vmatprep.mubr.msk.f32.mxu0 %vm467_vm1, %v3705_v13 }
 0x123   : > { %v7433_v14 = vpop.permute.xlu0 %4215  ;;  %v7439_v53 = vpop.permute.xlu1 %4230 }
 0x125   : > { %5675 = vmatmul.mubr.msk.f32.gmra.mrb[22].mxu1 %vm467_vm1, %v2017_v38  ;;  %5875 = vmatmul.mubr.msk.f32.gmra.mrb[22].mxu0 %vm467_vm1, %v3706_v15 }
 0x126   : > { %5677 = vmatprep.mubr.msk.f32.mxu1 %vm467_vm1, %v2018_v20  ;;  %5877 = vmatprep.mubr.msk.f32.mxu0 %vm467_vm1, %v3707_v63 }
 0x127   : > { %v7443_v34 = vpop.permute.xlu0 %4225  ;;  %v7455_v60 = vpop.permute.xlu1 %4240 }
 0x129   : > { %5678 = vmatmul.mubr.msk.f32.gmra.mrb[24].mxu1 %vm467_vm1, %v2019_v8  ;;  %5878 = vmatmul.mubr.msk.f32.gmra.mrb[24].mxu0 %vm467_vm1, %v3708_v43 }
 0x12a   : > { %5680 = vmatprep.mubr.msk.f32.mxu1 %vm467_vm1, %v2020_v11  ;;  %5880 = vmatprep.mubr.msk.f32.mxu0 %vm467_vm1, %v3709_v44 }
 0x12b   : > { %v7457_v47 = vpop.permute.xlu0 %4235  ;;  %v7462_v27 = vpop.permute.xlu1 %4250 }
 0x12d   : > { %5681 = vmatmul.mubr.msk.f32.gmra.mrb[26].mxu1 %vm467_vm1, %v2021_v29  ;;  %5881 = vmatmul.mubr.msk.f32.gmra.mrb[26].mxu0 %vm467_vm1, %v3710_v51  ;;  %v6171_v51 = vmov 0.28284273  }
 0x12e   : > { %5683 = vmatprep.mubr.msk.f32.mxu1 %vm467_vm1, %v2022_v22  ;;  %5883 = vmatprep.mubr.msk.f32.mxu0 %vm467_vm1, %v3711_v1 }
 0x12f   : > { %v7470_v20 = vpop.permute.xlu0 %4245  ;;  %v7483_v29 = vpop.permute.xlu1 %4260 }
 0x131   : > { %5684 = vmatmul.mubr.msk.f32.gmra.mrb[28].mxu1 %vm467_vm1, %v2023_v50  ;;  %5884 = vmatmul.mubr.msk.f32.gmra.mrb[28].mxu0 %vm467_vm1, %v3712_v12 }
 0x132   : > { %5686 = vmatprep.mubr.msk.f32.mxu1 %vm467_vm1, %v7222_v52  ;;  %5886 = vmatprep.mubr.msk.f32.mxu0 %vm467_vm1, %v3713_v31 }
 0x133   : > { %v7486_v61 = vpop.permute.xlu0 %4255 }
 0x135   : > { %5687 = vmatmul.mubr.msk.f32.gmra.mrb[30].mxu1 %vm467_vm1, %v7230_v5  ;;  %5887 = vmatmul.mubr.msk.f32.gmra.mrb[30].mxu0 %vm467_vm1, %v3714_v32 }
 0x1ac   : > { %v5593_v17 = vpop.f32.mrb[0].mxu1 }
 0x1ad   : > { %v1771_v4 = vpop.f32.mrb[1].mxu1 }
 0x1b0   : > { %v5596_v35 = vpop.f32.mrb[2].mxu1 }
 0x1b1   : > { %v1781_v2 = vpop.f32.mrb[3].mxu1 }
 0x1b4   : > { %v5599_v9 = vpop.f32.mrb[4].mxu1 }
 0x1b5   : > { %v1791_v59 = vpop.f32.mrb[5].mxu1 }
 0x1b8   : > { %v5602_v52 = vpop.f32.mrb[6].mxu1 }
 0x1b9   : > { %v7425_v19 = vpop.f32.mrb[7].mxu1 }
 0x1bc   : > { %v7427_v5 = vpop.f32.mrb[8].mxu1 }
 0x1bd   : > { %v7429_v10 = vpop.f32.mrb[9].mxu1 }
 0x1c0   : > { %v7435_v26 = vpop.f32.mrb[10].mxu1 }
 0x1c1   : > { %v7437_v37 = vpop.f32.mrb[11].mxu1 }
 0x1c4   : > { %v7441_v30 = vpop.f32.mrb[12].mxu1 }
 0x1c5   : > { %v7445_v58 = vpop.f32.mrb[13].mxu1 }
 0x1c8   : > { %v7447_v42 = vpop.f32.mrb[14].mxu1 }
 0x1c9   : > { %v7449_v46 = vpop.f32.mrb[15].mxu1 }
 0x1cc   : > { %v5843_v0 = vpop.f32.mrb[0].mxu0 }
 0x1cd   : > { %v5891_v3 = vadd.f32 %v5843_v0, %v5593_v17  ;;  %v3882_v13 = vpop.f32.mrb[1].mxu0 }
 0x1ce   : > { %v5892_v41 = vadd.f32 %v3882_v13, %v1771_v4 }
 0x1cf   : > { %v4081_v18 = vmul.f32 %v5891_v3, %v7459_v16 }
 0x1d0   : > { %v4080_v38 = vmul.f32 %v5892_v41, %v7459_v16  ;;  %v5846_v15 = vpop.f32.mrb[2].mxu0 }
 0x1d1   : > { %v4344_v63 = vadd.f32 %v4191_v54, %v4081_v18  ;;  %v5893_v23 = vadd.f32 %v5846_v15, %v5596_v35  ;;  %v3892_v24 = vpop.f32.mrb[3].mxu0 }
 0x1d2   : > { %v4343_v25 = vadd.f32 %v4186_v7, %v4080_v38  ;;  %v5894_v57 = vadd.f32 %v3892_v24, %v1781_v2  ;;  %v7507_v38 = vpop.permute.xlu0 %4265 }
 0x1d3   : > { %v4383_v8 = vadd.f32 %v7467_v21, %v4344_v63  ;;  %v4083_v43 = vmul.f32 %v5893_v23, %v7459_v16 }
 0x1d4   : > { %v4382_v11 = vadd.f32 %v7467_v21, %v4343_v25  ;;  %v4082_v44 = vmul.f32 %v5894_v57, %v7459_v16  ;;  %v5849_v40 = vpop.f32.mrb[4].mxu0 }
 0x1d5   : > { %vm4415_vm2 = vcmp.ge.f32.partialorder %v4383_v8, 0.0  ;;  %v4346_v56 = vadd.f32 %v4201_v45, %v4083_v43  ;;  %v5895_v55 = vadd.f32 %v5849_v40, %v5599_v9  ;;  %v3902_v28 = vpop.f32.mrb[5].mxu0 }
 0x1d6   : > { %v4447_v22 = vsel %vm4415_vm2, 1.4142135, %v6171_v51  ;;  %vm4414_vm3 = vcmp.ge.f32.partialorder %v4382_v11, 0.0  ;;  %v4345_v1 = vadd.f32 %v4196_v33, %v4082_v44  ;;  %v5896_v48 = vadd.f32 %v3902_v28, %v1791_v59 }
 0x1d7   : > { %v4479_v62 = vmul.f32 %v4447_v22, %v4383_v8  ;;  %v4446_v50 = vsel %vm4414_vm3, 1.4142135, %v6171_v51  ;;  %v4385_v12 = vadd.f32 %v7467_v21, %v4346_v56  ;;  %v4085_v31 = vmul.f32 %v5895_v55, %v7459_v16 }
 0x1d8   : > { %v4478_v39 = vmul.f32 %v4446_v50, %v4382_v11  ;;  %v4384_v32 = vadd.f32 %v7467_v21, %v4345_v1  ;;  %v4084_v17 = vmul.f32 %v5896_v48, %v7459_v16  ;;  %v5852_v7 = vpop.f32.mrb[6].mxu0  ;;  %v7534_v1 = vpop.permute.xlu0 %4275 }
 0x1d9   : > { %4511 = vst.msk [vmem:[%s7481_s20 + $0x8] sm:$0xff] %vm467_vm1, %v4479_v62  ;;  %vm4417_vm4 = vcmp.ge.f32.partialorder %v4385_v12, 0.0  ;;  %v4348_v33 = vadd.f32 %v4211_v6, %v4085_v31  ;;  %v5897_v4 = vadd.f32 %v5852_v7, %v5602_v52  ;;  %v3912_v35 = vpop.f32.mrb[7].mxu0  ;;  %v7503_v52 = vpop.permute.xlu1 %4270 }
 0x1da   : > { %4510 = vst.msk [vmem:[%s7481_s20] sm:$0xff] %vm467_vm1, %v4478_v39  ;;  %v4449_v2 = vsel %vm4417_vm4, 1.4142135, %v6171_v51  ;;  %vm4416_vm5 = vcmp.ge.f32.partialorder %v4384_v32, 0.0  ;;  %v4347_v45 = vadd.f32 %v7423_v36, %v4084_v17  ;;  %v5898_v54 = vadd.f32 %v3912_v35, %v7425_v19 }
 0x1db   : > { %v4481_v9 = vmul.f32 %v4449_v2, %v4385_v12  ;;  %v4448_v59 = vsel %vm4416_vm5, 1.4142135, %v6171_v51  ;;  %v4387_v0 = vadd.f32 %v7467_v21, %v4348_v33  ;;  %v4087_v6 = vmul.f32 %v5897_v4, %v7459_v16 }
 0x1dc   : > { %v4480_v3 = vmul.f32 %v4448_v59, %v4384_v32  ;;  %v4386_v13 = vadd.f32 %v7467_v21, %v4347_v45  ;;  %v4086_v41 = vmul.f32 %v5898_v54, %v7459_v16  ;;  %v5855_v18 = vpop.f32.mrb[8].mxu0 }
 0x1dd   : > { %4513 = vst.msk [vmem:[%s7481_s20 + $0x18] sm:$0xff] %vm467_vm1, %v4481_v9  ;;  %vm4419_vm6 = vcmp.ge.f32.partialorder %v4387_v0, 0.0  ;;  %v4350_v36 = vadd.f32 %v7431_v49, %v4087_v6  ;;  %v5899_v19 = vadd.f32 %v5855_v18, %v7427_v5  ;;  %v3922_v15 = vpop.f32.mrb[9].mxu0  ;;  %v7527_v56 = vpop.permute.xlu1 %4280 }
 0x1de   : > { %4512 = vst.msk [vmem:[%s7481_s20 + $0x10] sm:$0xff] %vm467_vm1, %v4480_v3  ;;  %v4451_v63 = vsel %vm4419_vm6, 1.4142135, %v6171_v51  ;;  %vm4418_vm7 = vcmp.ge.f32.partialorder %v4386_v13, 0.0  ;;  %v4349_v23 = vadd.f32 %v7433_v14, %v4086_v41  ;;  %v5900_v24 = vadd.f32 %v3922_v15, %v7429_v10 }
 0x1df   : > { %v4483_v25 = vmul.f32 %v4451_v63, %v4387_v0  ;;  %v4450_v57 = vsel %vm4418_vm7, 1.4142135, %v6171_v51  ;;  %v4389_v8 = vadd.f32 %v7467_v21, %v4350_v36  ;;  %v4089_v49 = vmul.f32 %v5899_v19, %v7459_v16  ;;  %v7557_v0 = vpop.permute.xlu0 %4285 }
 0x1e0   : > { %v4482_v43 = vmul.f32 %v4450_v57, %v4386_v13  ;;  %v4388_v5 = vadd.f32 %v7467_v21, %v4349_v23  ;;  %v4088_v11 = vmul.f32 %v5900_v24, %v7459_v16  ;;  %v5858_v44 = vpop.f32.mrb[10].mxu0 }
 0x1e1   : > { %4515 = vst.msk [vmem:[%s7481_s20 + $0x28] sm:$0xff] %vm467_vm1, %v4483_v25  ;;  %vm4421_vm8 = vcmp.ge.f32.partialorder %v4389_v8, 0.0  ;;  %v4352_v14 = vadd.f32 %v7439_v53, %v4089_v49  ;;  %v5901_v10 = vadd.f32 %v5858_v44, %v7435_v26  ;;  %v3932_v40 = vpop.f32.mrb[11].mxu0 }
 0x1e2   : > { %4514 = vst.msk [vmem:[%s7481_s20 + $0x20] sm:$0xff] %vm467_vm1, %v4482_v43  ;;  %v4453_v55 = vsel %vm4421_vm8, 1.4142135, %v6171_v51  ;;  %vm4420_vm9 = vcmp.ge.f32.partialorder %v4388_v5, 0.0  ;;  %v4351_v28 = vadd.f32 %v7443_v34, %v4088_v11  ;;  %v5902_v22 = vadd.f32 %v3932_v40, %v7437_v37 }
 0x1e3   : > { %v4485_v48 = vmul.f32 %v4453_v55, %v4389_v8  ;;  %v4452_v53 = vsel %vm4420_vm9, 1.4142135, %v6171_v51  ;;  %v4391_v26 = vadd.f32 %v7467_v21, %v4352_v14  ;;  %v4091_v62 = vmul.f32 %v5901_v10, %v7459_v16  ;;  %v7582_v11 = vpop.permute.xlu0 %4295 }
 0x1e4   : > { %v4484_v50 = vmul.f32 %v4452_v53, %v4388_v5  ;;  %v4390_v12 = vadd.f32 %v7467_v21, %v4351_v28  ;;  %v4090_v31 = vmul.f32 %v5902_v22, %v7459_v16  ;;  %v5861_v39 = vpop.f32.mrb[12].mxu0 }
 0x1e5   : > { %4517 = vst.msk [vmem:[%s7481_s20 + $0x38] sm:$0xff] %vm467_vm1, %v4485_v48  ;;  %vm4423_vm10 = vcmp.ge.f32.partialorder %v4391_v26, 0.0  ;;  %v4354_v37 = vadd.f32 %v7455_v60, %v4091_v62  ;;  %v5903_v34 = vadd.f32 %v5861_v39, %v7441_v30  ;;  %v3942_v32 = vpop.f32.mrb[13].mxu0  ;;  %v7553_v30 = vpop.permute.xlu1 %4290 }
 0x1e6   : > { %4516 = vst.msk [vmem:[%s7481_s20 + $0x30] sm:$0xff] %vm467_vm1, %v4484_v50  ;;  %v4455_v17 = vsel %vm4423_vm10, 1.4142135, %v6171_v51  ;;  %vm4422_vm11 = vcmp.ge.f32.partialorder %v4390_v12, 0.0  ;;  %v4353_v7 = vadd.f32 %v7457_v47, %v4090_v31  ;;  %v5904_v33 = vadd.f32 %v3942_v32, %v7445_v58 }
 0x1e7   : > { %v4487_v4 = vmul.f32 %v4455_v17, %v4391_v26  ;;  %v4454_v35 = vsel %vm4422_vm11, 1.4142135, %v6171_v51  ;;  %v4393_v2 = vadd.f32 %v7467_v21, %v4354_v37  ;;  %v4093_v60 = vmul.f32 %v5903_v34, %v7459_v16 }
 0x1e8   : > { %v4486_v45 = vmul.f32 %v4454_v35, %v4390_v12  ;;  %v4392_v54 = vadd.f32 %v7467_v21, %v4353_v7  ;;  %v4092_v9 = vmul.f32 %v5904_v33, %v7459_v16  ;;  %v5864_v59 = vpop.f32.mrb[14].mxu0 }
 0x1e9   : > { %4519 = vst.msk [vmem:[%s7481_s20 + $0x48] sm:$0xff] %vm467_vm1, %v4487_v4  ;;  %vm4425_vm12 = vcmp.ge.f32.partialorder %v4393_v2, 0.0  ;;  %v4356_v58 = vadd.f32 %v7462_v27, %v4093_v60  ;;  %v5905_v47 = vadd.f32 %v5864_v59, %v7447_v42  ;;  %v3952_v6 = vpop.f32.mrb[15].mxu0  ;;  %v7580_v5 = vpop.permute.xlu1 %4300 }
 0x1ea   : > { %4518 = vst.msk [vmem:[%s7481_s20 + $0x40] sm:$0xff] %vm467_vm1, %v4486_v45  ;;  %v4457_v3 = vsel %vm4425_vm12, 1.4142135, %v6171_v51  ;;  %vm4424_vm13 = vcmp.ge.f32.partialorder %v4392_v54, 0.0  ;;  %v4355_v13 = vadd.f32 %v7470_v20, %v4092_v9  ;;  %v5906_v41 = vadd.f32 %v3952_v6, %v7449_v46 }
 0x1eb   : > { %v4489_v18 = vmul.f32 %v4457_v3, %v4393_v2  ;;  %v4456_v36 = vsel %vm4424_vm13, 1.4142135, %v6171_v51  ;;  %v4395_v19 = vadd.f32 %v7467_v21, %v4356_v58  ;;  %v4095_v27 = vmul.f32 %v5905_v47, %v7459_v16  ;;  %v4306_v58 = vpop.permute.xlu0 %4305 }
 0x1ec   : > { %v4488_v42 = vmul.f32 %v4456_v36, %v4392_v54  ;;  %v4394_v15 = vadd.f32 %v7467_v21, %v4355_v13  ;;  %v4094_v63 = vmul.f32 %v5906_v41, %v7459_v16  ;;  %v5667_v23 = vpop.f32.mrb[16].mxu1  ;;  %v5867_v24 = vpop.f32.mrb[16].mxu0 }
 0x1ed   : > { %4521 = vst.msk [vmem:[%s7481_s20 + $0x58] sm:$0xff] %vm467_vm1, %v4489_v18  ;;  %vm4427_vm14 = vcmp.ge.f32.partialorder %v4395_v19, 0.0  ;;  %v4358_v46 = vadd.f32 %v7483_v29, %v4095_v27  ;;  %v5907_v20 = vadd.f32 %v5867_v24, %v5667_v23  ;;  %v2273_v25 = vpop.f32.mrb[17].mxu1  ;;  %v3962_v57 = vpop.f32.mrb[17].mxu0 }
 0x1ee   : > { %4520 = vst.msk [vmem:[%s7481_s20 + $0x50] sm:$0xff] %vm467_vm1, %v4488_v42  ;;  %v4459_v8 = vsel %vm4427_vm14, 1.4142135, %v6171_v51  ;;  %vm4426_vm15 = vcmp.ge.f32.partialorder %v4394_v15, 0.0  ;;  %v4357_v49 = vadd.f32 %v7486_v61, %v4094_v63  ;;  %v5908_v43 = vadd.f32 %v3962_v57, %v2273_v25  ;;  %v4311_v59 = vpop.permute.xlu1 %4310 }
 0x1ef   : > { %v4491_v44 = vmul.f32 %v4459_v8, %v4395_v19  ;;  %v4458_v29 = vsel %vm4426_vm15, 1.4142135, %v6171_v51  ;;  %v4397_v14 = vadd.f32 %v7467_v21, %v4358_v46  ;;  %v4097_v10 = vmul.f32 %v5907_v20, %v7459_v16 }
 0x1f0   : > { %v4490_v40 = vmul.f32 %v4458_v29, %v4394_v15  ;;  %v4396_v55 = vadd.f32 %v7467_v21, %v4357_v49  ;;  %v4096_v28 = vmul.f32 %v5908_v43, %v7459_v16  ;;  %v5670_v22 = vpop.f32.mrb[18].mxu1  ;;  %v5870_v61 = vpop.f32.mrb[18].mxu0 }
 0x1f1   : > { %4523 = vst.msk [vmem:[%s7481_s20 + $0x68] sm:$0xff] %vm467_vm1, %v4491_v44  ;;  %vm4429_vm0 = vcmp.ge.f32.partialorder %v4397_v14, 0.0  ;;  %v4360_v48 = vadd.f32 %v7503_v52, %v4097_v10  ;;  %v5909_v53 = vadd.f32 %v5870_v61, %v5670_v22  ;;  %v2283_v26 = vpop.f32.mrb[19].mxu1  ;;  %v3972_v62 = vpop.f32.mrb[19].mxu0 }
 0x1f2   : > { %4522 = vst.msk [vmem:[%s7481_s20 + $0x60] sm:$0xff] %vm467_vm1, %v4490_v40  ;;  %v4461_v50 = vsel %vm4429_vm0, 1.4142135, %v6171_v51  ;;  %vm4428_vm2 = vcmp.ge.f32.partialorder %v4396_v55, 0.0  ;;  %v4359_v12 = vadd.f32 %v7507_v38, %v4096_v28  ;;  %v5910_v31 = vadd.f32 %v3972_v62, %v2283_v26  ;;  %v4321_v22 = vpop.permute.xlu1 %4320  ;;  %v4316_v61 = vpop.permute.xlu0 %4315 }
 0x1f3   : > { %v4493_v39 = vmul.f32 %v4461_v50, %v4397_v14  ;;  %v4460_v37 = vsel %vm4428_vm2, 1.4142135, %v6171_v51  ;;  %v4399_v34 = vadd.f32 %v7467_v21, %v4360_v48  ;;  %v4099_v52 = vmul.f32 %v5909_v53, %v7459_v16 }
 0x1f4   : > { %v4492_v32 = vmul.f32 %v4460_v37, %v4396_v55  ;;  %v4398_v17 = vadd.f32 %v7467_v21, %v4359_v12  ;;  %v4098_v7 = vmul.f32 %v5910_v31, %v7459_v16  ;;  %v5673_v33 = vpop.f32.mrb[20].mxu1  ;;  %v5873_v4 = vpop.f32.mrb[20].mxu0 }
 0x1f5   : > { %4525 = vst.msk [vmem:[%s7481_s20 + $0x78] sm:$0xff] %vm467_vm1, %v4493_v39  ;;  %vm4431_vm3 = vcmp.ge.f32.partialorder %v4399_v34, 0.0  ;;  %v4362_v38 = vadd.f32 %v7527_v56, %v4099_v52  ;;  %v5911_v35 = vadd.f32 %v5873_v4, %v5673_v33  ;;  %v2293_v2 = vpop.f32.mrb[21].mxu1  ;;  %v3982_v60 = vpop.f32.mrb[21].mxu0 }
 0x1f6   : > { %4524 = vst.msk [vmem:[%s7481_s20 + $0x70] sm:$0xff] %vm467_vm1, %v4492_v32  ;;  %v4463_v45 = vsel %vm4431_vm3, 1.4142135, %v6171_v51  ;;  %vm4430_vm4 = vcmp.ge.f32.partialorder %v4398_v17, 0.0  ;;  %v4361_v54 = vadd.f32 %v7534_v1, %v4098_v7  ;;  %v5912_v9 = vadd.f32 %v3982_v60, %v2293_v2 }
 0x1f7   : > { %v4495_v47 = vmul.f32 %v4463_v45, %v4399_v34  ;;  %v4462_v6 = vsel %vm4430_vm4, 1.4142135, %v6171_v51  ;;  %v4401_v56 = vadd.f32 %v7467_v21, %v4362_v38  ;;  %v4101_v3 = vmul.f32 %v5911_v35, %v7459_v16 }
 0x1f8   : > { %v4494_v13 = vmul.f32 %v4462_v6, %v4398_v17  ;;  %v4400_v41 = vadd.f32 %v7467_v21, %v4361_v54  ;;  %v4100_v18 = vmul.f32 %v5912_v9, %v7459_v16  ;;  %v5676_v36 = vpop.f32.mrb[22].mxu1  ;;  %v5876_v19 = vpop.f32.mrb[22].mxu0 }
 0x1f9   : > { %4527 = vst.msk [vmem:[%s7481_s20 + $0x88] sm:$0xff] %vm467_vm1, %v4495_v47  ;;  %vm4433_vm5 = vcmp.ge.f32.partialorder %v4401_v56, 0.0  ;;  %v4364_v1 = vadd.f32 %v7553_v30, %v4101_v3  ;;  %v5913_v27 = vadd.f32 %v5876_v19, %v5676_v36  ;;  %v2303_v42 = vpop.f32.mrb[23].mxu1  ;;  %v3992_v15 = vpop.f32.mrb[23].mxu0 }
 0x1fa   : > { %4526 = vst.msk [vmem:[%s7481_s20 + $0x80] sm:$0xff] %vm467_vm1, %v4494_v13  ;;  %v4465_v63 = vsel %vm4433_vm5, 1.4142135, %v6171_v51  ;;  %vm4432_vm6 = vcmp.ge.f32.partialorder %v4400_v41, 0.0  ;;  %v4363_v23 = vadd.f32 %v7557_v0, %v4100_v18  ;;  %v5914_v24 = vadd.f32 %v3992_v15, %v2303_v42  ;;  %v4326_v18 = vpop.permute.xlu0 %4325 }
 0x1fb   : > { %v4497_v46 = vmul.f32 %v4465_v63, %v4401_v56  ;;  %v4464_v20 = vsel %vm4432_vm6, 1.4142135, %v6171_v51  ;;  %v4403_v25 = vadd.f32 %v7467_v21, %v4364_v1  ;;  %v4103_v30 = vmul.f32 %v5913_v27, %v7459_v16  ;;  %v4331_v56 = vpop.permute.xlu1 %4330 }
 0x1fc   : > { %v4496_v57 = vmul.f32 %v4464_v20, %v4400_v41  ;;  %v4402_v8 = vadd.f32 %v7467_v21, %v4363_v23  ;;  %v4102_v49 = vmul.f32 %v5914_v24, %v7459_v16  ;;  %v5679_v43 = vpop.f32.mrb[24].mxu1  ;;  %v5879_v44 = vpop.f32.mrb[24].mxu0 }
 0x1fd   : > { %4529 = vst.msk [vmem:[%s7481_s20 + $0x98] sm:$0xff] %vm467_vm1, %v4497_v46  ;;  %vm4435_vm7 = vcmp.ge.f32.partialorder %v4403_v25, 0.0  ;;  %v4366_v0 = vadd.f32 %v7580_v5, %v4103_v30  ;;  %v5915_v29 = vadd.f32 %v5879_v44, %v5679_v43  ;;  %v2313_v14 = vpop.f32.mrb[25].mxu1  ;;  %v4002_v10 = vpop.f32.mrb[25].mxu0 }
 0x1fe   : > { %4528 = vst.msk [vmem:[%s7481_s20 + $0x90] sm:$0xff] %vm467_vm1, %v4496_v57  ;;  %v4467_v40 = vsel %vm4435_vm7, 1.4142135, %v6171_v51  ;;  %vm4434_vm8 = vcmp.ge.f32.partialorder %v4402_v8, 0.0  ;;  %v4365_v55 = vadd.f32 %v7582_v11, %v4102_v49  ;;  %v5916_v28 = vadd.f32 %v4002_v10, %v2313_v14 }
 0x1ff   : > { %v4499_v48 = vmul.f32 %v4467_v40, %v4403_v25  ;;  %v4466_v53 = vsel %vm4434_vm8, 1.4142135, %v6171_v51  ;;  %v4405_v5 = vadd.f32 %v7467_v21, %v4366_v0  ;;  %v4105_v26 = vmul.f32 %v5915_v29, %v7459_v16  ;;  %v4341_v14 = vpop.permute.xlu1 %4340 }
 0x200   : > { %v4498_v62 = vmul.f32 %v4466_v53, %v4402_v8  ;;  %v4404_v50 = vadd.f32 %v7467_v21, %v4365_v55  ;;  %v4104_v12 = vmul.f32 %v5916_v28, %v7459_v16  ;;  %v5682_v31 = vpop.f32.mrb[26].mxu1  ;;  %v5882_v39 = vpop.f32.mrb[26].mxu0 }
 0x201   : > { %4531 = vst.msk [vmem:[%s7481_s20 + $0xa8] sm:$0xff] %vm467_vm1, %v4499_v48  ;;  %vm4437_vm9 = vcmp.ge.f32.partialorder %v4405_v5, 0.0  ;;  %v4368_v11 = vadd.f32 %v4311_v59, %v4105_v26  ;;  %v5917_v37 = vadd.f32 %v5882_v39, %v5682_v31  ;;  %v2323_v34 = vpop.f32.mrb[27].mxu1  ;;  %v4012_v52 = vpop.f32.mrb[27].mxu0 }
 0x202   : > { %4530 = vst.msk [vmem:[%s7481_s20 + $0xa0] sm:$0xff] %vm467_vm1, %v4498_v62  ;;  %v4469_v32 = vsel %vm4437_vm9, 1.4142135, %v6171_v51  ;;  %vm4436_vm10 = vcmp.ge.f32.partialorder %v4404_v50, 0.0  ;;  %v4367_v17 = vadd.f32 %v4306_v58, %v4104_v12  ;;  %v5918_v7 = vadd.f32 %v4012_v52, %v2323_v34  ;;  %v4336_v28 = vpop.permute.xlu0 %4335 }
 0x203   : > { %v4501_v33 = vmul.f32 %v4469_v32, %v4405_v5  ;;  %v4468_v4 = vsel %vm4436_vm10, 1.4142135, %v6171_v51  ;;  %v4407_v38 = vadd.f32 %v7467_v21, %v4368_v11  ;;  %v4107_v35 = vmul.f32 %v5917_v37, %v7459_v16 }
 0x204   : > { %v4500_v2 = vmul.f32 %v4468_v4, %v4404_v50  ;;  %v4406_v60 = vadd.f32 %v7467_v21, %v4367_v17  ;;  %v4106_v45 = vmul.f32 %v5918_v7, %v7459_v16  ;;  %v5685_v54 = vpop.f32.mrb[28].mxu1  ;;  %v5885_v9 = vpop.f32.mrb[28].mxu0 }
 0x205   : > { %4533 = vst.msk [vmem:[%s7481_s20 + $0xb8] sm:$0xff] %vm467_vm1, %v4501_v33  ;;  %vm4439_vm11 = vcmp.ge.f32.partialorder %v4407_v38, 0.0  ;;  %v4370_v59 = vadd.f32 %v4321_v22, %v4107_v35  ;;  %v5919_v58 = vadd.f32 %v5885_v9, %v5685_v54  ;;  %v2333_v47 = vpop.f32.mrb[29].mxu1  ;;  %v4022_v6 = vpop.f32.mrb[29].mxu0 }
 0x206   : > { %4532 = vst.msk [vmem:[%s7481_s20 + $0xb0] sm:$0xff] %vm467_vm1, %v4500_v2  ;;  %v4471_v3 = vsel %vm4439_vm11, 1.4142135, %v6171_v51  ;;  %vm4438_vm12 = vcmp.ge.f32.partialorder %v4406_v60, 0.0  ;;  %v4369_v13 = vadd.f32 %v4316_v61, %v4106_v45  ;;  %v5920_v41 = vadd.f32 %v4022_v6, %v2333_v47 }
 0x207   : > { %v4503_v36 = vmul.f32 %v4471_v3, %v4407_v38  ;;  %v4470_v19 = vsel %vm4438_vm12, 1.4142135, %v6171_v51  ;;  %v4409_v1 = vadd.f32 %v7467_v21, %v4370_v59  ;;  %v4109_v27 = vmul.f32 %v5919_v58, %v7459_v16 }
 0x208   : > { %v4502_v42 = vmul.f32 %v4470_v19, %v4406_v60  ;;  %v4408_v15 = vadd.f32 %v7467_v21, %v4369_v13  ;;  %v4108_v63 = vmul.f32 %v5920_v41, %v7459_v16  ;;  %v5688_v23 = vpop.f32.mrb[30].mxu1  ;;  %v5888_v24 = vpop.f32.mrb[30].mxu0 }
 0x209   : > { %4535 = vst.msk [vmem:[%s7481_s20 + $0xc8] sm:$0xff] %vm467_vm1, %v4503_v36  ;;  %vm4441_vm13 = vcmp.ge.f32.partialorder %v4409_v1, 0.0  ;;  %v4372_v46 = vadd.f32 %v4331_v56, %v4109_v27  ;;  %v5921_v20 = vadd.f32 %v5888_v24, %v5688_v23  ;;  %v2343_v25 = vpop.f32.mrb[31].mxu1  ;;  %v4032_v30 = vpop.f32.mrb[31].mxu0 }
 0x20a   : > { %4534 = vst.msk [vmem:[%s7481_s20 + $0xc0] sm:$0xff] %vm467_vm1, %v4502_v42  ;;  %v4473_v57 = vsel %vm4441_vm13, 1.4142135, %v6171_v51  ;;  %vm4440_vm14 = vcmp.ge.f32.partialorder %v4408_v15, 0.0  ;;  %v4371_v8 = vadd.f32 %v4326_v18, %v4108_v63  ;;  %v5922_v49 = vadd.f32 %v4032_v30, %v2343_v25 }
 0x20b   : > { %v4505_v43 = vmul.f32 %v4473_v57, %v4409_v1  ;;  %v4472_v44 = vsel %vm4440_vm14, 1.4142135, %v6171_v51  ;;  %v4411_v0 = vadd.f32 %v7467_v21, %v4372_v46  ;;  %v4111_v29 = vmul.f32 %v5921_v20, %v7459_v16 }
 0x20c   : > { %v4504_v10 = vmul.f32 %v4472_v44, %v4408_v15  ;;  %v4410_v40 = vadd.f32 %v7467_v21, %v4371_v8  ;;  %v4110_v55 = vmul.f32 %v5922_v49, %v7459_v16 }
 0x20d   : > { %4537 = vst.msk [vmem:[%s7481_s20 + $0xd8] sm:$0xff] %vm467_vm1, %v4505_v43  ;;  %vm4443_vm15 = vcmp.ge.f32.partialorder %v4411_v0, 0.0  ;;  %v4374_v22 = vadd.f32 %v4341_v14, %v4111_v29 }
 0x20e   : > { %4536 = vst.msk [vmem:[%s7481_s20 + $0xd0] sm:$0xff] %vm467_vm1, %v4504_v10  ;;  %v4475_v61 = vsel %vm4443_vm15, 1.4142135, %v6171_v51  ;;  %vm4442_vm0 = vcmp.ge.f32.partialorder %v4410_v40, 0.0  ;;  %v4373_v48 = vadd.f32 %v4336_v28, %v4110_v55 }
 0x20f   : > { %v4507_v53 = vmul.f32 %v4475_v61, %v4411_v0  ;;  %v4474_v5 = vsel %vm4442_vm0, 1.4142135, %v6171_v51  ;;  %v4413_v26 = vadd.f32 %v7467_v21, %v4374_v22 }
 0x210   : > { %v4506_v16 = vmul.f32 %v4474_v5, %v4410_v40  ;;  %v4412_v62 = vadd.f32 %v7467_v21, %v4373_v48 }
 0x211   : > { %4539 = vst.msk [vmem:[%s7481_s20 + $0xe8] sm:$0xff] %vm467_vm1, %v4507_v53  ;;  %vm4445_vm2 = vcmp.ge.f32.partialorder %v4413_v26, 0.0 }
 0x212   : > { %4538 = vst.msk [vmem:[%s7481_s20 + $0xe0] sm:$0xff] %vm467_vm1, %v4506_v16  ;;  %v4477_v50 = vsel %vm4445_vm2, 1.4142135, %v6171_v51  ;;  %vm4444_vm3 = vcmp.ge.f32.partialorder %v4412_v62, 0.0 }
 0x213   : > { %v4509_v12 = vmul.f32 %v4477_v50, %v4413_v26  ;;  %v4476_v31 = vsel %vm4444_vm3, 1.4142135, %v6171_v51 }
 0x214   : > { %v4508_v39 = vmul.f32 %v4476_v31, %v4412_v62 }
 0x215   : > { %4541 = vst.msk [vmem:[%s7481_s20 + $0xf8] sm:$0xff] %vm467_vm1, %v4509_v12 }
 0x216   : > { %4540 = vst.msk [vmem:[%s7481_s20 + $0xf0] sm:$0xff] %vm467_vm1, %v4508_v39 }
 0x217 PF: > { %s19_s26 = sadd.s32 1, %s6168_s26  }
 0x218   : > { %p16_p4 = scmp.ge.s32.totalorder %s19_s26, 4  }
 0x21a   :  { %18 = sbr.rel (!%p16_p4) target bundleno = 3 (0x3), region = 97 }

</bundles_post_ra>
